<compile_context>
chip_gen: v5e
topology: v5e:2x2
jax: 0.10.0
libtpu: 0.0.40
codegen_flags: <defaults>
</compile_context>

<pallas_src>
import numpy as np
import jax
import jax.numpy as jnp
from jax.experimental import pallas as pl
from jax.experimental.pallas import tpu as pltpu

EPS = 1e-5


def _full_spec(arr):
    nd = arr.ndim
    return pl.BlockSpec(arr.shape, lambda n, _nd=nd: (0,) * _nd)


# ---------------- in-kernel helpers ----------------

def _arm_cm(x, w1, s1, b1, w2, s2, b2):
    """AttentionRefinementModule, channel-major: x (Cin, HW) -> (Cout, HW)."""
    y = jnp.dot(w1, x, preferred_element_type=jnp.float32)          # 1x1 conv (bf16 MXU)
    y = jnp.maximum(y * s1 + b1, 0.0)                               # folded BN + ReLU
    pooled = jnp.mean(y, axis=1, keepdims=True)                     # AdaptiveAvgPool2d(1)
    att = jax.nn.sigmoid(
        jnp.dot(w2, pooled, preferred_element_type=jnp.float32) * s2 + b2)
    return y * att


def _resize_cm(x_cm, mh, mw):
    """Separable align_corners bilinear resize, channel-major.

    x_cm: (C, H_in*W_in) f32;  mh: (H_out, H_in), mw: (W_out, W_in) bf16.
    Returns (C, H_out*W_out) f32.  Both passes are batched MXU matmuls over the
    channel axis; no transposes, no scratch, f32 accumulation.
    """
    c = x_cm.shape[0]
    h_out, h_in = mh.shape
    w_out, w_in = mw.shape
    x3 = x_cm.astype(mw.dtype).reshape(c, h_in, w_in)               # (C, Hin, Win)
    # W pass: contract w  ('bqd,bkd->bqk' pattern).
    mw_b = jnp.broadcast_to(mw, (c, w_out, w_in))
    t = jnp.einsum("chw,cvw->chv", x3, mw_b,
                   preferred_element_type=jnp.float32)              # (C, Hin, Wout)
    # H pass: contract h  ('bqk,bkd->bqd' pattern).
    mh_b = jnp.broadcast_to(mh, (c, h_out, h_in))
    z = jnp.einsum("cgh,chv->cgv", mh_b, t.astype(mh.dtype),
                   preferred_element_type=jnp.float32)              # (C, Hout, Wout)
    return z.reshape(c, h_out * w_out)


# ---------------- fused Pallas kernel ----------------

def _context_path_kernel(
        c4_ref, c5_ref,
        w116_ref, s116_ref, b116_ref, w216_ref, s216_ref, b216_ref,
        w132_ref, s132_ref, b132_ref, w232_ref, s232_ref, b232_ref,
        wg_ref, sg_ref, bg_ref,
        mh45_ref, mw45_ref, mh4o_ref, mw4o_ref,
        o_ref):
    # ---- arm32(c5) + GlobalAvgPooling(c5), channel-major (Co, HW5) ----
    x5 = c5_ref[0]                                                  # (C5, HW5) bf16
    arm32 = _arm_cm(x5, w132_ref[...], s132_ref[...], b132_ref[...],
                    w232_ref[...], s232_ref[...], b232_ref[...])    # (Co, HW5) f32
    px5 = jnp.mean(x5.astype(jnp.float32), axis=1, keepdims=True)   # (C5, 1)
    gap = jnp.maximum(
        jnp.dot(wg_ref[...], px5, preferred_element_type=jnp.float32)
        * sg_ref[...] + bg_ref[...], 0.0)                           # (Co, 1)
    c5_fused = arm32 + gap                                          # broadcast over HW5

    # ---- arm16(c4) ----
    x4 = c4_ref[0]                                                  # (C4, HW4) bf16
    arm16 = _arm_cm(x4, w116_ref[...], s116_ref[...], b116_ref[...],
                    w216_ref[...], s216_ref[...], b216_ref[...])    # (Co, HW4) f32

    # ---- upsample c5_fused to c4 resolution, add, final 2x upsample ----
    up5 = _resize_cm(c5_fused, mh45_ref[...], mw45_ref[...])        # (Co, HW4) f32
    c4_fused = arm16 + up5                                          # (Co, HW4)
    out_cm = _resize_cm(c4_fused, mh4o_ref[...], mw4o_ref[...])     # (Co, HoWo)
    o_ref[0] = out_cm.astype(o_ref.dtype)                           # lane-dense store


# ---------------- wrapper ----------------

def context_path_forward(x_nchw, params):
    c4, c5 = backbone_stub(x_nchw, params["wb4"], params["wb5"])
    aux_out = [c4, c5]
    N, C4, H4, W4 = c4.shape
    _, C5, H5, W5 = c5.shape
    p16, p32, pg = params["arm16"], params["arm32"], params["gap"]
    Co = p16["w1"].shape[0]
    Ho, Wo = 2 * H4, 2 * W4

    # NCHW -> channel-major flattened (pure reshape, no transpose); bf16 operands.
    c4cm = c4.reshape(N, C4, H4 * W4).astype(jnp.bfloat16)
    c5cm = c5.reshape(N, C5, H5 * W5).astype(jnp.bfloat16)

    args = (c4cm, c5cm,
            p16["w1"], p16["s1"], p16["b1"], p16["w2"], p16["s2"], p16["b2"],
            p32["w1"], p32["s1"], p32["b1"], p32["w2"], p32["s2"], p32["b2"],
            pg["w"], pg["s"], pg["b"],
            params["mh45"], params["mw45"], params["mh4o"], params["mw4o"])

    out_flat = pl.pallas_call(
        _context_path_kernel,
        out_shape=jax.ShapeDtypeStruct((N, Co, Ho * Wo), jnp.float32),
        grid=(N,),
        in_specs=[pl.BlockSpec((1, C4, H4 * W4), lambda n: (n, 0, 0)),
                  pl.BlockSpec((1, C5, H5 * W5), lambda n: (n, 0, 0))]
                 + [_full_spec(a) for a in args[2:]],
        out_specs=pl.BlockSpec((1, Co, Ho * Wo), lambda n: (n, 0, 0)),
        compiler_params=pltpu.CompilerParams(
            dimension_semantics=("parallel",)),
    )(*args)

    out = out_flat.reshape(N, Co, Ho, Wo)                           # already NCHW
    return out, aux_out


# ---------------- glue: backbone stub, params, interpolation matrices ----------------

def backbone_stub(x_nchw, wb4, wb5):
    # TODO(synk): set_backbone() undefined in reference; deterministic
    # avgpool + 1x1 conv + ReLU stub producing stride-16 (c4) / stride-32 (c5).
    N, C, H, W = x_nchw.shape

    def down(x, s):
        return x.reshape(N, C, H // s, s, W // s, s).mean(axis=(3, 5))

    c4 = jnp.maximum(jnp.einsum("nchw,cd->ndhw", down(x_nchw, 16), wb4), 0.0)
    c5 = jnp.maximum(jnp.einsum("nchw,cd->ndhw", down(x_nchw, 32), wb5), 0.0)
    return c4, c5


def _bilinear_matrix(out_size, in_size):
    """PyTorch F.interpolate(mode='bilinear', align_corners=True), 1-D operator."""
    M = np.zeros((out_size, in_size), dtype=np.float32)
    if in_size == 1:
        M[:, 0] = 1.0
        return M
    scale = (in_size - 1) / (out_size - 1) if out_size > 1 else 0.0
    for o in range(out_size):
        src = o * scale
        i0 = min(int(np.floor(src)), in_size - 1)
        i1 = min(i0 + 1, in_size - 1)
        f = src - i0
        M[o, i0] += 1.0 - f
        M[o, i1] += f
    return M


def _bn_fold(key, c):
    k1, k2, k3, k4 = jax.random.split(key, 4)
    gamma = 1.0 + 0.1 * jax.random.normal(k1, (c,), jnp.float32)
    beta = 0.1 * jax.random.normal(k2, (c,), jnp.float32)
    mean = 0.1 * jax.random.normal(k3, (c,), jnp.float32)
    var = 1.0 + 0.1 * jnp.abs(jax.random.normal(k4, (c,), jnp.float32))
    scale = gamma / jnp.sqrt(var + EPS)
    bias = beta - mean * scale
    return scale.reshape(c, 1), bias.reshape(c, 1)          # channel-major column vectors


def _arm_params(key, cin, cout):
    k1, k2, k3, k4 = jax.random.split(key, 4)
    # conv weights stored in (Cout, Cin) orientation (matches squeezed 1x1 conv weight)
    w1 = (0.2 * jax.random.normal(k1, (cout, cin), jnp.float32)).astype(jnp.bfloat16)
    s1, b1 = _bn_fold(k2, cout)
    w2 = 0.2 * jax.random.normal(k3, (cout, cout), jnp.float32)   # tiny, keep f32
    s2, b2 = _bn_fold(k4, cout)
    return dict(w1=w1, s1=s1, b1=b1, w2=w2, s2=s2, b2=b2)


def make_params(key, in_ch, c4_ch, c5_ch, out_ch, H, W):
    ks = jax.random.split(key, 5)
    H4, W4, H5, W5 = H // 16, W // 16, H // 32, W // 32
    wb4 = 0.3 * jax.random.normal(ks[0], (in_ch, c4_ch), jnp.float32)
    wb5 = 0.3 * jax.random.normal(ks[1], (in_ch, c5_ch), jnp.float32)
    arm16 = _arm_params(ks[2], c4_ch, out_ch)
    arm32 = _arm_params(ks[3], c5_ch, out_ch)
    kg1, kg2 = jax.random.split(ks[4], 2)
    gap = dict(w=0.2 * jax.random.normal(kg1, (out_ch, c5_ch), jnp.float32))
    gap["s"], gap["b"] = _bn_fold(kg2, out_ch)
    # Separable (1-D) align_corners bilinear operators, bf16 operands.
    mh45 = jnp.asarray(_bilinear_matrix(H4, H5), dtype=jnp.bfloat16)
    mw45 = jnp.asarray(_bilinear_matrix(W4, W5), dtype=jnp.bfloat16)
    mh4o = jnp.asarray(_bilinear_matrix(2 * H4, H4), dtype=jnp.bfloat16)
    mw4o = jnp.asarray(_bilinear_matrix(2 * W4, W4), dtype=jnp.bfloat16)
    return dict(wb4=wb4, wb5=wb5, arm16=arm16, arm32=arm32, gap=gap,
                mh45=mh45, mw45=mw45, mh4o=mh4o, mw4o=mw4o)


# ---------------- pure-JAX reference (for correctness check) ----------------

def reference_forward(x_nchw, params):
    c4, c5 = backbone_stub(x_nchw, params["wb4"], params["wb5"])
    N, C4, H4, W4 = c4.shape
    _, C5, H5, W5 = c5.shape
    f32 = jnp.float32

    def arm(xcm, p):
        w1 = p["w1"].astype(f32)
        y = jnp.maximum(jnp.einsum("dc,nch->ndh", w1, xcm) * p["s1"] + p["b1"], 0.0)
        pooled = jnp.mean(y, axis=2, keepdims=True)
        att = jax.nn.sigmoid(
            jnp.einsum("dc,nch->ndh", p["w2"].astype(f32), pooled) * p["s2"] + p["b2"])
        return y * att

    c4cm = c4.reshape(N, C4, H4 * W4).astype(f32)
    c5cm = c5.reshape(N, C5, H5 * W5).astype(f32)
    a16 = arm(c4cm, params["arm16"])
    a32 = arm(c5cm, params["arm32"])
    gp = params["gap"]
    g = jnp.maximum(
        jnp.einsum("dc,nch->ndh", gp["w"].astype(f32),
                   jnp.mean(c5cm, axis=2, keepdims=True)) * gp["s"] + gp["b"], 0.0)
    c5f = a32 + g

    def resize(xcm, hi, wi, mh, mw):
        n, co, _ = xcm.shape
        x4 = xcm.reshape(n, co, hi, wi)
        mh = mh.astype(f32)
        mw = mw.astype(f32)
        t = jnp.einsum("gh,nchw->ncgw", mh, x4)
        y = jnp.einsum("vw,ncgw->ncgv", mw, t)
        return y.reshape(n, co, mh.shape[0] * mw.shape[0])

    up5 = resize(c5f, H5, W5, params["mh45"], params["mw45"])
    c4f = a16 + up5
    outf = resize(c4f, H4, W4, params["mh4o"], params["mw4o"])
    out = outf.reshape(N, -1, 2 * H4, 2 * W4)
    return out, [c4, c5]


if __name__ == "__main__":
    key = jax.random.PRNGKey(0)
    N, Cin, H, W = 2, 3, 64, 64
    out_ch, c4_ch, c5_ch = 8, 16, 32

    kx, kp = jax.random.split(key)
    x = jax.random.normal(kx, (N, Cin, H, W), dtype=jnp.float32)
    params = make_params(kp, Cin, c4_ch, c5_ch, out_ch, H, W)

    out, aux_out = context_path_forward(x, params)
    out = jax.block_until_ready(out)

    ref_out, _ = reference_forward(x, params)
    err = float(jnp.max(jnp.abs(out - ref_out)))
    tol = 1e-2 + 1e-2 * float(jnp.max(jnp.abs(ref_out)))    # bf16-operand headroom

    assert out.shape == (N, out_ch, 2 * (H // 16), 2 * (W // 16)), out.shape
    assert aux_out[0].shape == (N, c4_ch, H // 16, W // 16)
    assert aux_out[1].shape == (N, c5_ch, H // 32, W // 32)
    assert err < tol, f"Pallas vs reference mismatch: {err} (tol {tol})"

    print("KERNEL_OK")
</pallas_src>

<mosaic_0001>
module attributes {stable_mosaic.version = 11 : i64} {
  func.func @_context_path_kernel(%arg0: i32, %arg1: memref<1x16x16xbf16, #tpu.memory_space<vmem>>, %arg2: memref<1x32x4xbf16, #tpu.memory_space<vmem>>, %arg3: memref<8x16xbf16, #tpu.memory_space<vmem>>, %arg4: memref<8x1xf32, #tpu.memory_space<vmem>>, %arg5: memref<8x1xf32, #tpu.memory_space<vmem>>, %arg6: memref<8x8xf32, #tpu.memory_space<vmem>>, %arg7: memref<8x1xf32, #tpu.memory_space<vmem>>, %arg8: memref<8x1xf32, #tpu.memory_space<vmem>>, %arg9: memref<8x32xbf16, #tpu.memory_space<vmem>>, %arg10: memref<8x1xf32, #tpu.memory_space<vmem>>, %arg11: memref<8x1xf32, #tpu.memory_space<vmem>>, %arg12: memref<8x8xf32, #tpu.memory_space<vmem>>, %arg13: memref<8x1xf32, #tpu.memory_space<vmem>>, %arg14: memref<8x1xf32, #tpu.memory_space<vmem>>, %arg15: memref<8x32xf32, #tpu.memory_space<vmem>>, %arg16: memref<8x1xf32, #tpu.memory_space<vmem>>, %arg17: memref<8x1xf32, #tpu.memory_space<vmem>>, %arg18: memref<4x2xbf16, #tpu.memory_space<vmem>>, %arg19: memref<4x2xbf16, #tpu.memory_space<vmem>>, %arg20: memref<8x4xbf16, #tpu.memory_space<vmem>>, %arg21: memref<8x4xbf16, #tpu.memory_space<vmem>>, %arg22: memref<1x8x64xf32, #tpu.memory_space<vmem>>) attributes {dimension_semantics = [#tpu.dimension_semantics<parallel>], iteration_bounds = array<i64: 2>, scalar_prefetch = 0 : i64, scratch_operands = 0 : i64, tpu.core_type = #tpu.core_type<tc>, window_params = [{transform_indices = @transform_0, window_bounds = array<i64: 1, 16, 16>}, {transform_indices = @transform_1, window_bounds = array<i64: 1, 32, 4>}, {pipeline_mode = #tpu.pipeline_mode<synchronous>, transform_indices = @transform_2, window_bounds = array<i64: 8, 16>}, {pipeline_mode = #tpu.pipeline_mode<synchronous>, transform_indices = @transform_3, window_bounds = array<i64: 8, 1>}, {pipeline_mode = #tpu.pipeline_mode<synchronous>, transform_indices = @transform_4, window_bounds = array<i64: 8, 1>}, {pipeline_mode = #tpu.pipeline_mode<synchronous>, transform_indices = @transform_5, window_bounds = array<i64: 8, 8>}, {pipeline_mode = #tpu.pipeline_mode<synchronous>, transform_indices = @transform_6, window_bounds = array<i64: 8, 1>}, {pipeline_mode = #tpu.pipeline_mode<synchronous>, transform_indices = @transform_7, window_bounds = array<i64: 8, 1>}, {pipeline_mode = #tpu.pipeline_mode<synchronous>, transform_indices = @transform_8, window_bounds = array<i64: 8, 32>}, {pipeline_mode = #tpu.pipeline_mode<synchronous>, transform_indices = @transform_9, window_bounds = array<i64: 8, 1>}, {pipeline_mode = #tpu.pipeline_mode<synchronous>, transform_indices = @transform_10, window_bounds = array<i64: 8, 1>}, {pipeline_mode = #tpu.pipeline_mode<synchronous>, transform_indices = @transform_11, window_bounds = array<i64: 8, 8>}, {pipeline_mode = #tpu.pipeline_mode<synchronous>, transform_indices = @transform_12, window_bounds = array<i64: 8, 1>}, {pipeline_mode = #tpu.pipeline_mode<synchronous>, transform_indices = @transform_13, window_bounds = array<i64: 8, 1>}, {pipeline_mode = #tpu.pipeline_mode<synchronous>, transform_indices = @transform_14, window_bounds = array<i64: 8, 32>}, {pipeline_mode = #tpu.pipeline_mode<synchronous>, transform_indices = @transform_15, window_bounds = array<i64: 8, 1>}, {pipeline_mode = #tpu.pipeline_mode<synchronous>, transform_indices = @transform_16, window_bounds = array<i64: 8, 1>}, {pipeline_mode = #tpu.pipeline_mode<synchronous>, transform_indices = @transform_17, window_bounds = array<i64: 4, 2>}, {pipeline_mode = #tpu.pipeline_mode<synchronous>, transform_indices = @transform_18, window_bounds = array<i64: 4, 2>}, {pipeline_mode = #tpu.pipeline_mode<synchronous>, transform_indices = @transform_19, window_bounds = array<i64: 8, 4>}, {pipeline_mode = #tpu.pipeline_mode<synchronous>, transform_indices = @transform_20, window_bounds = array<i64: 8, 4>}, {transform_indices = @transform_21, window_bounds = array<i64: 1, 8, 64>}]} {
    %c0 = arith.constant 0 : index
    %c0_0 = arith.constant 0 : index
    %c0_1 = arith.constant 0 : index
    %0 = vector.load %arg2[%c0, %c0_0, %c0_1] : memref<1x32x4xbf16, #tpu.memory_space<vmem>>, vector<1x32x4xbf16>
    %1 = vector.shape_cast %0 : vector<1x32x4xbf16> to vector<32x4xbf16>
    %c0_2 = arith.constant 0 : index
    %c0_3 = arith.constant 0 : index
    %2 = vector.load %arg9[%c0_2, %c0_3] : memref<8x32xbf16, #tpu.memory_space<vmem>>, vector<8x32xbf16>
    %c0_4 = arith.constant 0 : index
    %c0_5 = arith.constant 0 : index
    %3 = vector.load %arg10[%c0_4, %c0_5] : memref<8x1xf32, #tpu.memory_space<vmem>>, vector<8x1xf32>
    %c0_6 = arith.constant 0 : index
    %c0_7 = arith.constant 0 : index
    %4 = vector.load %arg11[%c0_6, %c0_7] : memref<8x1xf32, #tpu.memory_space<vmem>>, vector<8x1xf32>
    %c0_8 = arith.constant 0 : index
    %c0_9 = arith.constant 0 : index
    %5 = vector.load %arg12[%c0_8, %c0_9] : memref<8x8xf32, #tpu.memory_space<vmem>>, vector<8x8xf32>
    %c0_10 = arith.constant 0 : index
    %c0_11 = arith.constant 0 : index
    %6 = vector.load %arg13[%c0_10, %c0_11] : memref<8x1xf32, #tpu.memory_space<vmem>>, vector<8x1xf32>
    %c0_12 = arith.constant 0 : index
    %c0_13 = arith.constant 0 : index
    %7 = vector.load %arg14[%c0_12, %c0_13] : memref<8x1xf32, #tpu.memory_space<vmem>>, vector<8x1xf32>
    %cst = arith.constant dense<0.000000e+00> : vector<8x4xf32>
    %8 = tpu.matmul %2, %1, %cst {dimension_numbers = #tpu.dot_dimension_numbers<[1], [0], [0], [1], [0, 0, 1, 1], [], []>} : vector<8x32xbf16>, vector<32x4xbf16>, vector<8x4xf32> -> vector<8x4xf32>
    %9 = vector.broadcast %3 : vector<8x1xf32> to vector<8x4xf32>
    %10 = arith.mulf %8, %9 : vector<8x4xf32>
    %11 = vector.broadcast %4 : vector<8x1xf32> to vector<8x4xf32>
    %12 = arith.addf %10, %11 : vector<8x4xf32>
    %cst_14 = arith.constant 0.000000e+00 : f32
    %13 = vector.broadcast %cst_14 : f32 to vector<8x4xf32>
    %14 = arith.maximumf %12, %13 : vector<8x4xf32>
    %cst_15 = arith.constant dense<0.000000e+00> : vector<8xf32>
    %15 = vector.multi_reduction <add>, %14, %cst_15 [1] : vector<8x4xf32> to vector<8xf32>
    %16 = vector.shape_cast %15 : vector<8xf32> to vector<8x1xf32>
    %cst_16 = arith.constant 4.000000e+00 : f32
    %17 = vector.broadcast %cst_16 : f32 to vector<8x1xf32>
    %18 = arith.divf %16, %17 : vector<8x1xf32>
    %cst_17 = arith.constant dense<0.000000e+00> : vector<8x1xf32>
    %19 = tpu.matmul %5, %18, %cst_17 {dimension_numbers = #tpu.dot_dimension_numbers<[1], [0], [0], [1], [0, 0, 1, 1], [], []>} : vector<8x8xf32>, vector<8x1xf32>, vector<8x1xf32> -> vector<8x1xf32>
    %20 = arith.mulf %19, %6 : vector<8x1xf32>
    %21 = arith.addf %20, %7 : vector<8x1xf32>
    %22 = arith.negf %21 : vector<8x1xf32>
    %23 = math.exp %22 : vector<8x1xf32>
    %cst_18 = arith.constant 1.000000e+00 : f32
    %24 = vector.broadcast %cst_18 : f32 to vector<8x1xf32>
    %25 = arith.addf %24, %23 : vector<8x1xf32>
    %26 = arith.divf %24, %25 : vector<8x1xf32>
    %27 = vector.broadcast %26 : vector<8x1xf32> to vector<8x4xf32>
    %28 = arith.mulf %14, %27 : vector<8x4xf32>
    %29 = arith.extf %1 : vector<32x4xbf16> to vector<32x4xf32>
    %cst_19 = arith.constant dense<0.000000e+00> : vector<32xf32>
    %30 = vector.multi_reduction <add>, %29, %cst_19 [1] : vector<32x4xf32> to vector<32xf32>
    %31 = vector.shape_cast %30 : vector<32xf32> to vector<32x1xf32>
    %cst_20 = arith.constant 4.000000e+00 : f32
    %32 = vector.broadcast %cst_20 : f32 to vector<32x1xf32>
    %33 = arith.divf %31, %32 : vector<32x1xf32>
    %c0_21 = arith.constant 0 : index
    %c0_22 = arith.constant 0 : index
    %34 = vector.load %arg15[%c0_21, %c0_22] : memref<8x32xf32, #tpu.memory_space<vmem>>, vector<8x32xf32>
    %cst_23 = arith.constant dense<0.000000e+00> : vector<8x1xf32>
    %35 = tpu.matmul %34, %33, %cst_23 {dimension_numbers = #tpu.dot_dimension_numbers<[1], [0], [0], [1], [0, 0, 1, 1], [], []>} : vector<8x32xf32>, vector<32x1xf32>, vector<8x1xf32> -> vector<8x1xf32>
    %c0_24 = arith.constant 0 : index
    %c0_25 = arith.constant 0 : index
    %36 = vector.load %arg16[%c0_24, %c0_25] : memref<8x1xf32, #tpu.memory_space<vmem>>, vector<8x1xf32>
    %37 = arith.mulf %35, %36 : vector<8x1xf32>
    %c0_26 = arith.constant 0 : index
    %c0_27 = arith.constant 0 : index
    %38 = vector.load %arg17[%c0_26, %c0_27] : memref<8x1xf32, #tpu.memory_space<vmem>>, vector<8x1xf32>
    %39 = arith.addf %37, %38 : vector<8x1xf32>
    %cst_28 = arith.constant 0.000000e+00 : f32
    %40 = vector.broadcast %cst_28 : f32 to vector<8x1xf32>
    %41 = arith.maximumf %39, %40 : vector<8x1xf32>
    %42 = vector.broadcast %41 : vector<8x1xf32> to vector<8x4xf32>
    %43 = arith.addf %28, %42 : vector<8x4xf32>
    %c0_29 = arith.constant 0 : index
    %c0_30 = arith.constant 0 : index
    %c0_31 = arith.constant 0 : index
    %44 = vector.load %arg1[%c0_29, %c0_30, %c0_31] : memref<1x16x16xbf16, #tpu.memory_space<vmem>>, vector<1x16x16xbf16>
    %45 = vector.shape_cast %44 : vector<1x16x16xbf16> to vector<16x16xbf16>
    %c0_32 = arith.constant 0 : index
    %c0_33 = arith.constant 0 : index
    %46 = vector.load %arg3[%c0_32, %c0_33] : memref<8x16xbf16, #tpu.memory_space<vmem>>, vector<8x16xbf16>
    %c0_34 = arith.constant 0 : index
    %c0_35 = arith.constant 0 : index
    %47 = vector.load %arg4[%c0_34, %c0_35] : memref<8x1xf32, #tpu.memory_space<vmem>>, vector<8x1xf32>
    %c0_36 = arith.constant 0 : index
    %c0_37 = arith.constant 0 : index
    %48 = vector.load %arg5[%c0_36, %c0_37] : memref<8x1xf32, #tpu.memory_space<vmem>>, vector<8x1xf32>
    %c0_38 = arith.constant 0 : index
    %c0_39 = arith.constant 0 : index
    %49 = vector.load %arg6[%c0_38, %c0_39] : memref<8x8xf32, #tpu.memory_space<vmem>>, vector<8x8xf32>
    %c0_40 = arith.constant 0 : index
    %c0_41 = arith.constant 0 : index
    %50 = vector.load %arg7[%c0_40, %c0_41] : memref<8x1xf32, #tpu.memory_space<vmem>>, vector<8x1xf32>
    %c0_42 = arith.constant 0 : index
    %c0_43 = arith.constant 0 : index
    %51 = vector.load %arg8[%c0_42, %c0_43] : memref<8x1xf32, #tpu.memory_space<vmem>>, vector<8x1xf32>
    %cst_44 = arith.constant dense<0.000000e+00> : vector<8x16xf32>
    %52 = tpu.matmul %46, %45, %cst_44 {dimension_numbers = #tpu.dot_dimension_numbers<[1], [0], [0], [1], [0, 0, 1, 1], [], []>} : vector<8x16xbf16>, vector<16x16xbf16>, vector<8x16xf32> -> vector<8x16xf32>
    %53 = vector.broadcast %47 : vector<8x1xf32> to vector<8x16xf32>
    %54 = arith.mulf %52, %53 : vector<8x16xf32>
    %55 = vector.broadcast %48 : vector<8x1xf32> to vector<8x16xf32>
    %56 = arith.addf %54, %55 : vector<8x16xf32>
    %cst_45 = arith.constant 0.000000e+00 : f32
    %57 = vector.broadcast %cst_45 : f32 to vector<8x16xf32>
    %58 = arith.maximumf %56, %57 : vector<8x16xf32>
    %cst_46 = arith.constant dense<0.000000e+00> : vector<8xf32>
    %59 = vector.multi_reduction <add>, %58, %cst_46 [1] : vector<8x16xf32> to vector<8xf32>
    %60 = vector.shape_cast %59 : vector<8xf32> to vector<8x1xf32>
    %cst_47 = arith.constant 1.600000e+01 : f32
    %61 = vector.broadcast %cst_47 : f32 to vector<8x1xf32>
    %62 = arith.divf %60, %61 : vector<8x1xf32>
    %cst_48 = arith.constant dense<0.000000e+00> : vector<8x1xf32>
    %63 = tpu.matmul %49, %62, %cst_48 {dimension_numbers = #tpu.dot_dimension_numbers<[1], [0], [0], [1], [0, 0, 1, 1], [], []>} : vector<8x8xf32>, vector<8x1xf32>, vector<8x1xf32> -> vector<8x1xf32>
    %64 = arith.mulf %63, %50 : vector<8x1xf32>
    %65 = arith.addf %64, %51 : vector<8x1xf32>
    %66 = arith.negf %65 : vector<8x1xf32>
    %67 = math.exp %66 : vector<8x1xf32>
    %cst_49 = arith.constant 1.000000e+00 : f32
    %68 = vector.broadcast %cst_49 : f32 to vector<8x1xf32>
    %69 = arith.addf %68, %67 : vector<8x1xf32>
    %70 = arith.divf %68, %69 : vector<8x1xf32>
    %71 = vector.broadcast %70 : vector<8x1xf32> to vector<8x16xf32>
    %72 = arith.mulf %58, %71 : vector<8x16xf32>
    %c0_50 = arith.constant 0 : index
    %c0_51 = arith.constant 0 : index
    %73 = vector.load %arg18[%c0_50, %c0_51] : memref<4x2xbf16, #tpu.memory_space<vmem>>, vector<4x2xbf16>
    %c0_52 = arith.constant 0 : index
    %c0_53 = arith.constant 0 : index
    %74 = vector.load %arg19[%c0_52, %c0_53] : memref<4x2xbf16, #tpu.memory_space<vmem>>, vector<4x2xbf16>
    %75 = arith.truncf %43 : vector<8x4xf32> to vector<8x4xbf16>
    %76 = vector.shape_cast %75 : vector<8x4xbf16> to vector<8x2x2xbf16>
    %77 = vector.shape_cast %74 : vector<4x2xbf16> to vector<1x4x2xbf16>
    %78 = vector.broadcast %77 : vector<1x4x2xbf16> to vector<8x4x2xbf16>
    "tpu.trace_start"() <{level = 10 : i32, message = "chw,cvw->chv"}> : () -> ()
    %cst_54 = arith.constant dense<0.000000e+00> : vector<8x2x4xf32>
    %79 = tpu.matmul %76, %78, %cst_54 {dimension_numbers = #tpu.dot_dimension_numbers<[2], [2], [1], [1], [0, 0, 0, 1, 1, 1], [0], [0]>} : vector<8x2x2xbf16>, vector<8x4x2xbf16>, vector<8x2x4xf32> -> vector<8x2x4xf32>
    "tpu.trace_stop"() : () -> ()
    %80 = vector.shape_cast %73 : vector<4x2xbf16> to vector<1x4x2xbf16>
    %81 = vector.broadcast %80 : vector<1x4x2xbf16> to vector<8x4x2xbf16>
    %82 = arith.truncf %79 : vector<8x2x4xf32> to vector<8x2x4xbf16>
    "tpu.trace_start"() <{level = 10 : i32, message = "cgh,chv->cgv"}> : () -> ()
    %cst_55 = arith.constant dense<0.000000e+00> : vector<8x4x4xf32>
    %83 = tpu.matmul %81, %82, %cst_55 {dimension_numbers = #tpu.dot_dimension_numbers<[2], [1], [1], [2], [0, 0, 0, 1, 1, 2], [0], [0]>} : vector<8x4x2xbf16>, vector<8x2x4xbf16>, vector<8x4x4xf32> -> vector<8x4x4xf32>
    "tpu.trace_stop"() : () -> ()
    %84 = vector.shape_cast %83 : vector<8x4x4xf32> to vector<8x16xf32>
    %85 = arith.addf %72, %84 : vector<8x16xf32>
    %c0_56 = arith.constant 0 : index
    %c0_57 = arith.constant 0 : index
    %86 = vector.load %arg20[%c0_56, %c0_57] : memref<8x4xbf16, #tpu.memory_space<vmem>>, vector<8x4xbf16>
    %c0_58 = arith.constant 0 : index
    %c0_59 = arith.constant 0 : index
    %87 = vector.load %arg21[%c0_58, %c0_59] : memref<8x4xbf16, #tpu.memory_space<vmem>>, vector<8x4xbf16>
    %88 = arith.truncf %85 : vector<8x16xf32> to vector<8x16xbf16>
    %89 = vector.shape_cast %88 : vector<8x16xbf16> to vector<8x4x4xbf16>
    %90 = vector.shape_cast %87 : vector<8x4xbf16> to vector<1x8x4xbf16>
    %91 = vector.broadcast %90 : vector<1x8x4xbf16> to vector<8x8x4xbf16>
    "tpu.trace_start"() <{level = 10 : i32, message = "chw,cvw->chv"}> : () -> ()
    %cst_60 = arith.constant dense<0.000000e+00> : vector<8x4x8xf32>
    %92 = tpu.matmul %89, %91, %cst_60 {dimension_numbers = #tpu.dot_dimension_numbers<[2], [2], [1], [1], [0, 0, 0, 1, 1, 1], [0], [0]>} : vector<8x4x4xbf16>, vector<8x8x4xbf16>, vector<8x4x8xf32> -> vector<8x4x8xf32>
    "tpu.trace_stop"() : () -> ()
    %93 = vector.shape_cast %86 : vector<8x4xbf16> to vector<1x8x4xbf16>
    %94 = vector.broadcast %93 : vector<1x8x4xbf16> to vector<8x8x4xbf16>
    %95 = arith.truncf %92 : vector<8x4x8xf32> to vector<8x4x8xbf16>
    "tpu.trace_start"() <{level = 10 : i32, message = "cgh,chv->cgv"}> : () -> ()
    %cst_61 = arith.constant dense<0.000000e+00> : vector<8x8x8xf32>
    %96 = tpu.matmul %94, %95, %cst_61 {dimension_numbers = #tpu.dot_dimension_numbers<[2], [1], [1], [2], [0, 0, 0, 1, 1, 2], [0], [0]>} : vector<8x8x4xbf16>, vector<8x4x8xbf16>, vector<8x8x8xf32> -> vector<8x8x8xf32>
    "tpu.trace_stop"() : () -> ()
    %97 = vector.shape_cast %96 : vector<8x8x8xf32> to vector<8x64xf32>
    %c0_62 = arith.constant 0 : index
    %c0_63 = arith.constant 0 : index
    %c0_64 = arith.constant 0 : index
    %98 = vector.load %arg22[%c0_62, %c0_63, %c0_64] : memref<1x8x64xf32, #tpu.memory_space<vmem>>, vector<1x8x64xf32>
    %99 = vector.shape_cast %98 : vector<1x8x64xf32> to vector<8x64xf32>
    %100 = vector.shape_cast %97 : vector<8x64xf32> to vector<1x8x64xf32>
    tpu.vector_store %arg22[%c0_62, %c0_63, %c0_64], %100 {strides = array<i32>} : memref<1x8x64xf32, #tpu.memory_space<vmem>>, vector<1x8x64xf32>,
    return
  }
  func.func @transform_0(%arg0: i32) -> (i32, i32, i32) {
    %c0_i32 = arith.constant 0 : i32
    %c0_i32_0 = arith.constant 0 : i32
    %c0_i32_1 = arith.constant 0 : i32
    return %arg0, %c0_i32, %c0_i32_0 : i32, i32, i32
  }
  func.func @transform_1(%arg0: i32) -> (i32, i32, i32) {
    %c0_i32 = arith.constant 0 : i32
    %c0_i32_0 = arith.constant 0 : i32
    %c0_i32_1 = arith.constant 0 : i32
    return %arg0, %c0_i32, %c0_i32_0 : i32, i32, i32
  }
  func.func @transform_2(%arg0: i32) -> (i32, i32) {
    %c0_i32 = arith.constant 0 : i32
    %c0_i32_0 = arith.constant 0 : i32
    %c0_i32_1 = arith.constant 0 : i32
    return %c0_i32, %c0_i32_0 : i32, i32
  }
  func.func @transform_3(%arg0: i32) -> (i32, i32) {
    %c0_i32 = arith.constant 0 : i32
    %c0_i32_0 = arith.constant 0 : i32
    %c0_i32_1 = arith.constant 0 : i32
    return %c0_i32, %c0_i32_0 : i32, i32
  }
  func.func @transform_4(%arg0: i32) -> (i32, i32) {
    %c0_i32 = arith.constant 0 : i32
    %c0_i32_0 = arith.constant 0 : i32
    %c0_i32_1 = arith.constant 0 : i32
    return %c0_i32, %c0_i32_0 : i32, i32
  }
  func.func @transform_5(%arg0: i32) -> (i32, i32) {
    %c0_i32 = arith.constant 0 : i32
    %c0_i32_0 = arith.constant 0 : i32
    %c0_i32_1 = arith.constant 0 : i32
    return %c0_i32, %c0_i32_0 : i32, i32
  }
  func.func @transform_6(%arg0: i32) -> (i32, i32) {
    %c0_i32 = arith.constant 0 : i32
    %c0_i32_0 = arith.constant 0 : i32
    %c0_i32_1 = arith.constant 0 : i32
    return %c0_i32, %c0_i32_0 : i32, i32
  }
  func.func @transform_7(%arg0: i32) -> (i32, i32) {
    %c0_i32 = arith.constant 0 : i32
    %c0_i32_0 = arith.constant 0 : i32
    %c0_i32_1 = arith.constant 0 : i32
    return %c0_i32, %c0_i32_0 : i32, i32
  }
  func.func @transform_8(%arg0: i32) -> (i32, i32) {
    %c0_i32 = arith.constant 0 : i32
    %c0_i32_0 = arith.constant 0 : i32
    %c0_i32_1 = arith.constant 0 : i32
    return %c0_i32, %c0_i32_0 : i32, i32
  }
  func.func @transform_9(%arg0: i32) -> (i32, i32) {
    %c0_i32 = arith.constant 0 : i32
    %c0_i32_0 = arith.constant 0 : i32
    %c0_i32_1 = arith.constant 0 : i32
    return %c0_i32, %c0_i32_0 : i32, i32
  }
  func.func @transform_10(%arg0: i32) -> (i32, i32) {
    %c0_i32 = arith.constant 0 : i32
    %c0_i32_0 = arith.constant 0 : i32
    %c0_i32_1 = arith.constant 0 : i32
    return %c0_i32, %c0_i32_0 : i32, i32
  }
  func.func @transform_11(%arg0: i32) -> (i32, i32) {
    %c0_i32 = arith.constant 0 : i32
    %c0_i32_0 = arith.constant 0 : i32
    %c0_i32_1 = arith.constant 0 : i32
    return %c0_i32, %c0_i32_0 : i32, i32
  }
  func.func @transform_12(%arg0: i32) -> (i32, i32) {
    %c0_i32 = arith.constant 0 : i32
    %c0_i32_0 = arith.constant 0 : i32
    %c0_i32_1 = arith.constant 0 : i32
    return %c0_i32, %c0_i32_0 : i32, i32
  }
  func.func @transform_13(%arg0: i32) -> (i32, i32) {
    %c0_i32 = arith.constant 0 : i32
    %c0_i32_0 = arith.constant 0 : i32
    %c0_i32_1 = arith.constant 0 : i32
    return %c0_i32, %c0_i32_0 : i32, i32
  }
  func.func @transform_14(%arg0: i32) -> (i32, i32) {
    %c0_i32 = arith.constant 0 : i32
    %c0_i32_0 = arith.constant 0 : i32
    %c0_i32_1 = arith.constant 0 : i32
    return %c0_i32, %c0_i32_0 : i32, i32
  }
  func.func @transform_15(%arg0: i32) -> (i32, i32) {
    %c0_i32 = arith.constant 0 : i32
    %c0_i32_0 = arith.constant 0 : i32
    %c0_i32_1 = arith.constant 0 : i32
    return %c0_i32, %c0_i32_0 : i32, i32
  }
  func.func @transform_16(%arg0: i32) -> (i32, i32) {
    %c0_i32 = arith.constant 0 : i32
    %c0_i32_0 = arith.constant 0 : i32
    %c0_i32_1 = arith.constant 0 : i32
    return %c0_i32, %c0_i32_0 : i32, i32
  }
  func.func @transform_17(%arg0: i32) -> (i32, i32) {
    %c0_i32 = arith.constant 0 : i32
    %c0_i32_0 = arith.constant 0 : i32
    %c0_i32_1 = arith.constant 0 : i32
    return %c0_i32, %c0_i32_0 : i32, i32
  }
  func.func @transform_18(%arg0: i32) -> (i32, i32) {
    %c0_i32 = arith.constant 0 : i32
    %c0_i32_0 = arith.constant 0 : i32
    %c0_i32_1 = arith.constant 0 : i32
    return %c0_i32, %c0_i32_0 : i32, i32
  }
  func.func @transform_19(%arg0: i32) -> (i32, i32) {
    %c0_i32 = arith.constant 0 : i32
    %c0_i32_0 = arith.constant 0 : i32
    %c0_i32_1 = arith.constant 0 : i32
    return %c0_i32, %c0_i32_0 : i32, i32
  }
  func.func @transform_20(%arg0: i32) -> (i32, i32) {
    %c0_i32 = arith.constant 0 : i32
    %c0_i32_0 = arith.constant 0 : i32
    %c0_i32_1 = arith.constant 0 : i32
    return %c0_i32, %c0_i32_0 : i32, i32
  }
  func.func @transform_21(%arg0: i32) -> (i32, i32, i32) {
    %c0_i32 = arith.constant 0 : i32
    %c0_i32_0 = arith.constant 0 : i32
    %c0_i32_1 = arith.constant 0 : i32
    return %arg0, %c0_i32, %c0_i32_0 : i32, i32, i32
  }
}

</mosaic_0001>

<bundles_post_ra>
// kernel: tpu_custom_call.1
= control target key start
LH: loop header
LB: loop body
LE: loop exit
PB: predicated region body
PF: predicated region fallthrough
CT: control target
= control target key end

     0   :  { %s2599_s0 = inlined_call_operand.vmem [shape: bf16[2,16,16], index: 0, kind: input, shape index: {}]   ;;  %s2600_s1 = inlined_call_operand.vmem [shape: bf16[2,32,4], index: 1, kind: input, shape index: {}]   ;;  %s2601_s2 = inlined_call_operand.vmem [shape: bf16[8,16], index: 2, kind: input, shape index: {}]   ;;  %s2602_s3 = inlined_call_operand.vmem [shape: f32[8,1], index: 3, kind: input, shape index: {}]   ;;  %s2603_s4 = inlined_call_operand.vmem [shape: f32[8,1], index: 4, kind: input, shape index: {}]   ;;  %s2604_s5 = inlined_call_operand.vmem [shape: f32[8,8], index: 5, kind: input, shape index: {}]   ;;  %s2605_s6 = inlined_call_operand.vmem [shape: f32[8,1], index: 6, kind: input, shape index: {}]   ;;  %s2606_s7 = inlined_call_operand.vmem [shape: f32[8,1], index: 7, kind: input, shape index: {}]   ;;  %s2607_s8 = inlined_call_operand.vmem [shape: bf16[8,32], index: 8, kind: input, shape index: {}]   ;;  %s2608_s9 = inlined_call_operand.vmem [shape: f32[8,1], index: 9, kind: input, shape index: {}]   ;;  %s2609_s10 = inlined_call_operand.vmem [shape: f32[8,1], index: 10, kind: input, shape index: {}]   ;;  %s2610_s11 = inlined_call_operand.vmem [shape: f32[8,8], index: 11, kind: input, shape index: {}]   ;;  %s2611_s12 = inlined_call_operand.vmem [shape: f32[8,1], index: 12, kind: input, shape index: {}]   ;;  %s2612_s13 = inlined_call_operand.vmem [shape: f32[8,1], index: 13, kind: input, shape index: {}]   ;;  %s2613_s14 = inlined_call_operand.vmem [shape: f32[8,32], index: 14, kind: input, shape index: {}]   ;;  %s2614_s15 = inlined_call_operand.vmem [shape: f32[8,1], index: 15, kind: input, shape index: {}]   ;;  %s2615_s16 = inlined_call_operand.vmem [shape: f32[8,1], index: 16, kind: input, shape index: {}]   ;;  %s2616_s17 = inlined_call_operand.vmem [shape: bf16[4,2], index: 17, kind: input, shape index: {}]   ;;  %s2617_s18 = inlined_call_operand.vmem [shape: bf16[4,2], index: 18, kind: input, shape index: {}]   ;;  %s2618_s19 = inlined_call_operand.vmem [shape: bf16[8,4], index: 19, kind: input, shape index: {}]   ;;  %s2619_s20 = inlined_call_operand.vmem [shape: bf16[8,4], index: 20, kind: input, shape index: {}]   ;;  %s2620_s21 = inlined_call_operand.hbm [shape: f32[2,8,64], index: 21, kind: output, shape index: {}]  }
   0x1   :  { %2625 = sst [smem:[#allocation9_spill]] %s2599_s0 }
   0x2   :  { %2626 = sst [smem:[#allocation10_spill]] %s2600_s1 }
   0x3   :  { %2627 = sst [smem:[#allocation11_spill]] %s2601_s2 }
   0x4   :  { %2628 = sst [smem:[#allocation12_spill]] %s2602_s3 }
   0x5   :  { %2629 = sst [smem:[#allocation13_spill]] %s2603_s4 }
   0x6   :  { %2630 = sst [smem:[#allocation14_spill]] %s2604_s5 }
   0x7   :  { %2631 = sst [smem:[#allocation15_spill]] %s2607_s8 }
   0x8   :  { %2632 = sst [smem:[#allocation16_spill]] %s2608_s9 }
   0x9   :  { %2633 = sst [smem:[#allocation17_spill]] %s2609_s10 }
   0xa   :  { %26 = vsyncpa [#allocation3], 0 }
   0xb   :  { %28 = vsyncpa [#allocation3 + $0x1], 0  ;;  %s2266_s2 = smov 0   ;;  %s2268_s25 = smov 0  }
   0xc   :  { %s2270_s26 = smov 0   ;;  %s2272_s27 = smov 0  }
   0xd LB: > { %2634 = sst [smem:[#allocation5_spill]] %s2132_s26  ;;  %s2287_s3 = sadd.s32 4294967295, %s2136_s27   ;;  %s2136_s27 = sphi %s2272_s27, %s2650_s27   ;;  %s2132_s26 = sphi %s2270_s26, %s2652_s26   ;;  %s2128_s25 = sphi %s2268_s25, %s2654_s25   ;;  %s2124_s2 = sphi %s2266_s2, %s2653_s2  }
   0xe   : > { %s1933_s28 = sadd.s32 4294967294, %s2136_s27   ;;  %s2291_s29 = sadd.s32 1, %s2136_s27  }
   0xf   : > { %2635 = sst [smem:[#allocation6_spill]] %s2291_s29  ;;  %s492_s0 = sadd.s32 1, %s2132_s26 }
  0x10   : > { %s489_s4 = ssub.s32 %s2136_s27, %s2291_s29  ;;  %p502_p0 = scmp.ne.s32.totalorder %s2132_s26, %s2128_s25 }
  0x11   : > { %p490_p1 = scmp.eq.s32.totalorder %s489_s4, 0  ;;  %p503_p2 = scmp.eq.s32.totalorder %s2287_s3, 1 }
  0x12   : > { %p508_p3 = scmp.ne.s32.totalorder %s2128_s25, %s2124_s2  ;;  %p509_p4 = scmp.eq.s32.totalorder %s1933_s28, 1 }
  0x13   : > { %s2302_s30 = scalar_select %p490_p1, %s2132_s26, %s492_s0  }
  0x14   : > { %p2304_p5 = por %p503_p2, %p502_p0  ;;  %p2308_p6 = por %p509_p4, %p508_p3 }
  0x15   : > { %2636 = sst [smem:[#allocation7_spill]] %s2302_s30  ;;  %p1936_p7 = scmp.ge.s32.totalorder %s2136_s27, 1 }
  0x16   : > { %s2638_s22 = scalar_select %p2308_p6, 1, 0 }
  0x17   : > { %p600_p8 = scmp.lt.s32.totalorder %s2136_s27, 3 }
  0x18   : > { %2639 = sst [smem:[#allocation8_spill]] %s2638_s22 }
  0x19   : > { %p601_p9 = pnand %p1936_p7, %p600_p8 }
  0x1a   : > { %p665_p10 = scmp.lt.s32.totalorder (!%p601_p9), %s2287_s3, 1  ;;  %s2640_s9 = sld [smem:[#allocation16_spill]] (!%p601_p9) }
  0x1b   : > { %604 = sbr.rel (%p601_p9) target bundleno = 1669 (0x685), region = 104  ;;  %s2641_s30 = sld [smem:[#allocation10_spill]] (!%p601_p9) }
  0x1c   : > { %s2642_s10 = sld [smem:[#allocation17_spill]] (!%p601_p9)  ;;  %s2140_s22 = smov (!%p601_p9), 126  }
  0x1d   : > { %s2643_s8 = sld [smem:[#allocation15_spill]] (!%p601_p9)  ;;  %s2145_s29 = smov (!%p601_p9), 8  }
  0x1e   : > { %s2644_s23 = sld [smem:[#allocation9_spill]] (!%p601_p9) }
  0x1f   : > { %s2646_s4 = sld [smem:[#allocation12_spill]] (!%p601_p9) }
  0x20   : > { %v681_v0 = vld [vmem:[%s2640_s9] sm:$0xff]  ;;  %v2138_v1 = vmov 0   ;;  %s2319_s24 = scalar_select %p665_p10, %s2287_s3, 1  ;;  %vm698_vm0 = vcmask 261120   ;;  %vm728_vm1 = vcmask 31744   ;;  %v2139_v24 = vmov 4.0  }
  0x21   : > { %2059 = vset.pattern.permute.xlu0 %v2138_v1  ;;  %2060 = vset.pattern.permute.xlu1 %v2138_v1  ;;  %2062 = vrcp.f32 %v2139_v24  ;;  %v683_v34 = vld [vmem:[%s2610_s11] sm:$0xff]  ;;  %vm740_vm3 = vcmask 64512   ;;  %vm860_vm4 = vcmask 130048   ;;  %vm1002_vm9 = vcmask 15360  }
  0x22   : > { %717 = vperm.xlu0 %2059, %v681_v0   ;;  %2061 = vset.pattern.permute.xlu2 %v2138_v1  ;;  %s1998_s28 = sshll.u32 %s2319_s24, 4  ;;  %v682_v3 = vld [vmem:[%s2642_s10] sm:$0xff]  ;;  %v2141_v24 = vmov 1983009808   ;;  %vm969_vm10 = vcmask 1047556   ;;  %vm1145_vm12 = vcmask 1040384  }
  0x23   : > { %s674_s26 = scalar_lea.vmem %s2641_s30, %s1998_s28  ;;  %v680_v5 = vld [vmem:[%s2643_s8] sm:$0xf]  ;;  %s1997_s28 = sshll.u32 %s2319_s24, 3 }
  0x24   : > { %v2000_v2 = vld [vmem:[%s674_s26 + $0x8] sm:$0xff]  ;;  %v1999_v4 = vld [vmem:[%s674_s26] sm:$0xff]  ;;  %s669_s1 = scalar_lea.vmem %s2644_s23, %s1997_s28  ;;  %s2645_s8 = sld [smem:[#allocation11_spill]] }
  0x25   : > { %708 = vmatpush.bf16.msra.mxu0 %v2000_v2  ;;  %v678_v6 = vld [vmem:[%s674_s26 + $0x8] sm:$0xff]   ;;  %v677_v9 = vld [vmem:[%s674_s26] sm:$0xff]   ;;  %s2647_s26 = sld [smem:[#allocation13_spill]]  ;;  %s2146_s30 = smov 12  }
  0x26   : > { %v793_v7 = vunpack.c.l.bf16 %v678_v6  ;;  %v792_v10 = vunpack.c.h.bf16 %v677_v9  ;;  %v791_v11 = vunpack.c.l.bf16 %v677_v9  ;;  %v794_v22 = vunpack.c.h.bf16 %v678_v6  ;;  %v811_v42 = vld [vmem:[%s2613_s14] sm:$0xff]  ;;  %s2648_s28 = sld [smem:[#allocation14_spill]]  ;;  %s2149_s24 = smov 124  }
  0x27   : > { %v2063_v25 = vpop.eup %2062  ;;  %v2001_v43 = vld [vmem:[%s669_s1] sm:$0xff]  ;;  %s2151_s23 = smov 16   ;;  %s2152_s1 = smov 32  }
  0x28   : > { %v801_v8 = vsel %vm728_vm1, %v793_v7, 0.0  ;;  %v798_v12 = vsel %vm728_vm1, %v792_v10, 0.0  ;;  %v795_v13 = vsel %vm728_vm1, %v791_v11, 0.0  ;;  %v804_v23 = vsel %vm728_vm1, %v794_v22, 0.0  ;;  %871 = vmatpush.bf16.msra.mxu3 %v2001_v43  ;;  %v684_v45 = vld [vmem:[%s2611_s12] sm:$0xff] }
  0x29   : > { %709 = vmatpush.bf16.msra.mxu0 %v1999_v4  ;;  %802 = vadd.xlane.f32.xlu2 %v801_v8  ;;  %v733_v26 = vmul.f32 4.0, %v2063_v25  ;;  %vm737_vm2 = vweird.f32 %v2063_v25  ;;  %v685_v46 = vld [vmem:[%s2612_s13] sm:$0xff] }
  0x2a   : > { %723 = vperm.xlu0 %2059, %v682_v3   ;;  %v848_v44 = vld [vmem:[%s2645_s8] sm:$0xf]  ;;  %s2148_s8 = smov 120  }
  0x2b   : > { %v734_v27 = vsub.f32 1.0, %v733_v26  ;;  %1958 = vmatmul.msk.bf16.vlgmr.msra.gmra.mxu3 %vm860_vm4, %v848_v44  ;;  %v835_v53 = vld [vmem:[%s2614_s15] sm:$0xff] }
  0x2c   : > { %1950 = vmatmul.msk.bf16.vlgmr.msra.gmra.mxu0 %vm698_vm0, %v680_v5  ;;  %v837_v55 = vld [vmem:[%s2615_s16] sm:$0xff] }
  0x2d   : > { %v735_v28 = vmul.f32 %v2063_v25, %v734_v27  ;;  %v849_v5 = vld [vmem:[%s2646_s4] sm:$0xff]  ;;  %s2150_s4 = smov 24  }
  0x2e   : > { %v850_v6 = vld [vmem:[%s2647_s26] sm:$0xff]  ;;  %s2144_s26 = smov 4  }
  0x2f   : > { %v736_v29 = vadd.f32 %v2063_v25, %v735_v28  ;;  %v952_v9 = vld [vmem:[%s2617_s18] sm:$0x3] }
  0x30   : > { %v2380_v10 = vsel %vm1002_vm9, %v952_v9, 0 }
  0x31   : > { %799 = vadd.xlane.f32.xlu2 %v798_v12  ;;  %v738_v30 = vsel %vm737_vm2, %v2063_v25, %v736_v29  ;;  %1048 = vmatpush.bf16.xpose.msrb.mxu3 %v2380_v10  ;;  %v965_v25 = vunpack.c.l.s4 %v2141_v24  ;;  %v853_v24 = vld [vmem:[%s2606_s7] sm:$0xff] }
  0x32   : > { %1064 = vmatpush.bf16.xpose.msrb.mxu0 %v2380_v10 }
  0x33   : > { %v2396_v26 = vunpack.c.0.s8 %v965_v25 }
  0x39   : > { %1112 = vmatpush.bf16.xpose.msra.mxu3 %v2380_v10 }
  0x3a   : > { %1128 = vmatpush.bf16.xpose.msra.mxu0 %v2380_v10 }
  0x54   : > { %796 = vadd.xlane.f32.xlu0 %v795_v13 }
  0x94   : > { %v718_v14 = vpop.permute.xlu0 %717 }
  0x9c   : > { %v724_v17 = vpop.permute.xlu0 %723  ;;  %v803_v31 = vpop.xlane.xlu2 %802 }
  0x9d   : > { %v809_v37 = vmul.f32 %v803_v31, %v738_v30 }
  0xa4   : > { %v800_v36 = vpop.xlane.xlu2 %799 }
  0xa5   : > { %v808_v40 = vmul.f32 %v800_v36, %v738_v30  ;;  %v2143_v36 = vmov 16.0  }
  0xa9   : > { %v711_v15 = vpop.f32.mrf.mxu0 }
  0xaa   : > { %v720_v16 = vmul.f32 %v718_v14, %v711_v15 }
  0xac   : > { %v2335_v18 = vadd.f32 %v724_v17, %v720_v16 }
  0xae   : > { %v727_v19 = vmax.f32 %v2335_v18, 0.0  ;;  %v873_v7 = vpop.f32.mrf.mxu3  ;;  %v2142_v18 = vmov 1934713408  }
  0xb0   : > { %v729_v20 = vsel %vm728_vm1, %v727_v19, 0.0 }
  0xb1   : > { %730 = vadd.xlane.f32.xlu1 %v729_v20  ;;  %v713_v21 = vpop.f32.mrf.mxu0 }
  0xb6   : > { %v875_v8 = vpop.f32.mrf.mxu3 }
  0xb9   : > { %805 = vadd.xlane.f32.xlu1 %v804_v23 }
  0xc7   : > { %v797_v39 = vpop.xlane.xlu0 %796 }
  0xc8   : > { %v807_v41 = vmul.f32 %v797_v39, %v738_v30 }
 0x124   : > { %v731_v32 = vpop.xlane.xlu1 %730 }
 0x125   : > { %v739_v33 = vmul.f32 %v738_v30, %v731_v32 }
 0x127   : > { %759 = vmatpush.msra.mxu1 %v739_v33 }
 0x128   : > { %1951 = vmatmul.msk.f32.vlgmr.msra.gmra.mxu1 %vm740_vm3, %v683_v34 }
 0x12c   : > { %v806_v35 = vpop.xlane.xlu1 %805 }
 0x12d   : > { %v810_v38 = vmul.f32 %v806_v35, %v738_v30 }
 0x12f   : > { %827 = vmatpush.msra.mxu2 %v810_v38 }
 0x131   : > { %828 = vmatpush.msra.mxu2 %v809_v37 }
 0x133   : > { %829 = vmatpush.msra.mxu2 %v808_v40 }
 0x135   : > { %830 = vmatpush.msra.mxu2 %v807_v41 }
 0x136   : > { %1953 = vmatmul.msk.f32.vlgmr.msra.gmra.mxu2 %vm698_vm0, %v811_v42 }
 0x137   : > { %1016 = vmatpush.bf16.xpose.msrb.mxu2 %v2380_v10 }
 0x13f   : > { %1080 = vmatpush.bf16.xpose.msra.mxu2 %v2380_v10 }
 0x1a5   : > { %v761_v47 = vpop.f32.mrf.mxu1 }
 0x1a6   : > { %v764_v48 = vmul.f32 %v761_v47, %v684_v45 }
 0x1a8   : > { %v765_v49 = vadd.f32 %v764_v48, %v685_v46 }
 0x1aa   : > { %v1952_v50 = vmul.f32 -1.442695, %v765_v49 }
 0x1ac   : > { %2064 = vpow2.f32 %v1952_v50 }
 0x1b2   : > { %v2065_v51 = vpop.eup %2064 }
 0x1b3   : > { %v769_v52 = vadd.f32 1.0, %v2065_v51 }
 0x1b5   : > { %2066 = vrcp.f32 %v769_v52  ;;  %v781_v62 = vand.u32 2147483648, %v769_v52  ;;  %v779_v0 = vand.u32 2147483647, %v769_v52  ;;  %vm775_vm6 = vweird.f32 %v769_v52 }
 0x1b6   : > { %2068 = vrcp.f32 %v2143_v36 }
 0x1b7   : > { %v782_v2 = vor.u32 1.1754944e-38, %v781_v62  ;;  %vm780_vm8 = vcmp.eq.f32.partialorder %v779_v0, 8.507059e+37 }
 0x1b9   : > { %v832_v54 = vpop.f32.mrf.mxu2 }
 0x1ba   : > { %v836_v56 = vmul.f32 %v835_v53, %v832_v54 }
 0x1bb   : > { %v2067_v57 = vpop.eup %2066 }
 0x1bc   : > { %v771_v58 = vmul.f32 %v2067_v57, %v769_v52  ;;  %v838_v59 = vadd.f32 %v837_v55, %v836_v56  ;;  %vm776_vm5 = vweird.f32 %v2067_v57  ;;  %v2069_v42 = vpop.eup %2068 }
 0x1bd   : > { %vm777_vm7 = vmor %vm775_vm6, %vm776_vm5  ;;  %v894_v46 = vmul.f32 16.0, %v2069_v42  ;;  %vm898_vm11 = vweird.f32 %v2069_v42  ;;  %vm1345_vm5 = vcmask 97280   ;;  %vm1564_vm6 = vcmask 1041408  }
 0x1be   : > { %v772_v60 = vsub.f32 1.0, %v771_v58  ;;  %v839_v61 = vmax.f32 %v838_v59, 0.0 }
 0x1bf   : > { %v895_v49 = vsub.f32 1.0, %v894_v46 }
 0x1c0   : > { %v773_v63 = vmul.f32 %v2067_v57, %v772_v60  ;;  %842 = vperm.xlu2 %2061, %v839_v61   ;;  %v851_v60 = vld [vmem:[%s2648_s28] sm:$0xff] }
 0x1c1   : > { %v896_v52 = vmul.f32 %v2069_v42, %v895_v49 }
 0x1c2   : > { %v774_v1 = vadd.f32 %v2067_v57, %v773_v63 }
 0x1c3   : > { %v897_v55 = vadd.f32 %v2069_v42, %v896_v52 }
 0x1c4   : > { %v778_v3 = vsel %vm777_vm7, %v2067_v57, %v774_v1  ;;  %vm1838_vm7 = vcmask 326656  }
 0x1c5   : > { %v783_v4 = vsel %vm780_vm8, %v782_v2, %v778_v3  ;;  %v899_v57 = vsel %vm898_vm11, %v2069_v42, %v897_v55  ;;  %vm1840_vm8 = vcmask 392192  }
 0x1c6   : > { %787 = vperm.xlu1 %2060, %v783_v4  }
 0x1c8   : > { %879 = vperm.xlu2 %2061, %v849_v5   ;;  %v951_v5 = vld [vmem:[%s2616_s17] sm:$0x3] }
 0x1ce   : > { %885 = vperm.xlu1 %2060, %v850_v6  }
 0x21a   : > { %v843_v11 = vpop.permute.xlu2 %842 }
 0x222   : > { %v880_v15 = vpop.permute.xlu2 %879 }
 0x223   : > { %v882_v17 = vmul.f32 %v880_v15, %v873_v7 }
 0x238   : > { %v788_v12 = vpop.permute.xlu1 %787 }
 0x239   : > { %v790_v13 = vmul.f32 %v788_v12, %v727_v19  ;;  %v972_v19 = vunpack.c.l.s4 %v2142_v18 }
 0x23b   : > { %v845_v14 = vadd.f32 %v843_v11, %v790_v13  ;;  %v2398_v29 = vunpack.c.0.s8 %v972_v19 }
 0x23d   : > { %v953_v16 = vpack.c.bf16 %v845_v14, %v845_v14 }
 0x23f   : > { %955 = vrot.lane.b32.xlu2 %v953_v16, %s2140_s22  ;;  %v960_v28 = vshrl.u32 %v953_v16, 16  ;;  %s2147_s22 = smov 116  }
 0x240   : > { %v886_v20 = vpop.permute.xlu1 %885 }
 0x241   : > { %v2390_v21 = vadd.f32 %v886_v20, %v882_v17  ;;  %v852_v20 = vld [vmem:[%s2605_s6] sm:$0xff] }
 0x243   : > { %v889_v22 = vmax.f32 %v2390_v21, 0.0 }
 0x245   : > { %v890_v23 = vsel %vm860_vm4, %v889_v22, 0.0 }
 0x246   : > { %891 = vadd.xlane.f32.xlu1 %v890_v23 }
 0x299   : > { %v956_v27 = vpop.permute.xlu2 %955 }
 0x29a   : > { %v959_v30 = vpack.i.b16 %v956_v27, %v953_v16  ;;  %v961_v31 = vshrl.u32 %v956_v27, 16 }
 0x29c   : > { %v962_v32 = vpack.i.b16 %v961_v31, %v960_v28  ;;  %v967_v33 = vperm.slane %v959_v30, %v2396_v26 }
 0x29e   : > { %v974_v34 = vperm.slane %v967_v33, %v2398_v29  ;;  %v987_v35 = vperm.slane %v962_v32, %v2396_v26  ;;  %v968_v41 = vrot.slane %v967_v33, 4 }
 0x2a0   : > { %1961 = vmatmul.msk.bf16.vlgmr.msrb.gmra.mxu2 %vm1002_vm9, %v974_v34  ;;  %v979_v37 = vrot.slane %v974_v34, 4  ;;  %v993_v38 = vperm.slane %v987_v35, %v2398_v29  ;;  %v988_v44 = vrot.slane %v987_v35, 4  ;;  %v970_v45 = vsel %vm969_vm10, 0, %v968_v41 }
 0x2a1   : > { %v978_v48 = vperm.slane %v970_v45, %v2398_v29 }
 0x2a2   : > { %v980_v39 = vsel %vm969_vm10, 0, %v979_v37  ;;  %v998_v40 = vrot.slane %v993_v38, 4  ;;  %v989_v47 = vsel %vm969_vm10, 0, %v988_v44 }
 0x2a3   : > { %1963 = vmatmul.msk.bf16.vlgmr.msrb.gmra.mxu3 %vm1002_vm9, %v980_v39  ;;  %v997_v50 = vperm.slane %v989_v47, %v2398_v29  ;;  %v981_v51 = vrot.slane %v978_v48, 4 }
 0x2a4   : > { %v999_v43 = vsel %vm969_vm10, 0, %v998_v40 }
 0x2a5   : > { %1964 = vmatmul.msk.bf16.vlgmr.msrb.gmra.mxu0 %vm1002_vm9, %v999_v43  ;;  %v1000_v53 = vrot.slane %v997_v50, 4  ;;  %v982_v54 = vsel %vm969_vm10, 0, %v981_v51 }
 0x2a7   : > { %v1001_v56 = vsel %vm969_vm10, 0, %v1000_v53 }
 0x2b0   : > { %1965 = vmatmul.msk.bf16.vlgmr.msra.gmra.mxu2 %vm1002_vm9, %v978_v48 }
 0x2b3   : > { %1967 = vmatmul.msk.bf16.vlgmr.msra.gmra.mxu3 %vm1002_vm9, %v982_v54 }
 0x2b5   : > { %1968 = vmatmul.msk.bf16.vlgmr.msra.gmra.mxu0 %vm1002_vm9, %v1001_v56 }
 0x2b9   : > { %v892_v58 = vpop.xlane.xlu1 %891 }
 0x2ba   : > { %v900_v59 = vmul.f32 %v899_v57, %v892_v58 }
 0x2bc   : > { %919 = vmatpush.msrb.mxu1 %v900_v59 }
 0x2bd   : > { %1959 = vmatmul.msk.f32.vlgmr.msrb.gmra.mxu1 %vm740_vm3, %v851_v60 }
 0x2be   : > { %1032 = vmatpush.bf16.xpose.msra.mxu1 %v2380_v10 }
 0x2c5   : > { %1962 = vmatmul.msk.bf16.vlgmr.msra.gmra.mxu1 %vm1002_vm9, %v993_v38 }
 0x2c6   : > { %1096 = vmatpush.bf16.xpose.msrb.mxu1 %v2380_v10 }
 0x2d5   : > { %1966 = vmatmul.msk.bf16.vlgmr.msrb.gmra.mxu1 %vm1002_vm9, %v997_v50 }
 0x322   : > { %v1066_v61 = vpop.f32.mrf.mxu0 }
 0x323   : > { %v1137_v62 = vpack.c.bf16 %v1066_v61, %v1066_v61  ;;  %v1018_v63 = vpop.f32.mrf.mxu2 }
 0x324   : > { %v1134_v0 = vpack.c.bf16 %v1018_v63, %v1018_v63 }
 0x325   : > { %v1195_v1 = vsel %vm1145_vm12, %v1137_v62, 0 }
 0x326   : > { %v1147_v2 = vsel %vm1145_vm12, %v1134_v0, 0  ;;  %v1050_v3 = vpop.f32.mrf.mxu3  ;;  %1204 = vmatpush.bf16.msrb.mxu0 %v1195_v1 }
 0x327   : > { %v1136_v4 = vpack.c.bf16 %v1050_v3, %v1050_v3  ;;  %1156 = vmatpush.bf16.msrb.mxu2 %v1147_v2 }
 0x329   : > { %v1179_v6 = vsel %vm1145_vm12, %v1136_v4, 0  ;;  %1972 = vmatmul.msk.bf16.vlgmr.msrb.gmra.mxu0 %vm1002_vm9, %v951_v5 }
 0x32a   : > { %v1068_v7 = vpop.f32.mrf.mxu0  ;;  %1188 = vmatpush.bf16.msrb.mxu3 %v1179_v6  ;;  %1969 = vmatmul.msk.bf16.vlgmr.msrb.gmra.mxu2 %vm1002_vm9, %v951_v5 }
 0x32b   : > { %v1020_v8 = vpop.f32.mrf.mxu2 }
 0x32d   : > { %1971 = vmatmul.msk.bf16.vlgmr.msrb.gmra.mxu3 %vm1002_vm9, %v951_v5 }
 0x32e   : > { %v1052_v9 = vpop.f32.mrf.mxu3 }
 0x332   : > { %v1130_v10 = vpop.f32.mrf.mxu0 }
 0x333   : > { %v1141_v11 = vpack.c.bf16 %v1130_v10, %v1130_v10  ;;  %v1082_v12 = vpop.f32.mrf.mxu2 }
 0x334   : > { %v1138_v13 = vpack.c.bf16 %v1082_v12, %v1082_v12 }
 0x335   : > { %v1259_v14 = vsel %vm1145_vm12, %v1141_v11, 0 }
 0x336   : > { %v1211_v15 = vsel %vm1145_vm12, %v1138_v13, 0  ;;  %v1114_v16 = vpop.f32.mrf.mxu3  ;;  %1268 = vmatpush.bf16.msra.mxu0 %v1259_v14 }
 0x337   : > { %v1140_v17 = vpack.c.bf16 %v1114_v16, %v1114_v16  ;;  %1220 = vmatpush.bf16.msra.mxu2 %v1211_v15 }
 0x339   : > { %v1243_v23 = vsel %vm1145_vm12, %v1140_v17, 0  ;;  %1976 = vmatmul.msk.bf16.vlgmr.msra.gmra.mxu0 %vm1002_vm9, %v951_v5 }
 0x33a   : > { %v921_v25 = vpop.f32.mrf.mxu1  ;;  %v1132_v18 = vpop.f32.mrf.mxu0  ;;  %1252 = vmatpush.bf16.msra.mxu3 %v1243_v23  ;;  %1973 = vmatmul.msk.bf16.vlgmr.msra.gmra.mxu2 %vm1002_vm9, %v951_v5 }
 0x33b   : > { %v924_v19 = vmul.f32 %v921_v25, %v852_v20  ;;  %v1084_v27 = vpop.f32.mrf.mxu2 }
 0x33d   : > { %v925_v28 = vadd.f32 %v924_v19, %v853_v24  ;;  %1975 = vmatmul.msk.bf16.vlgmr.msra.gmra.mxu3 %vm1002_vm9, %v951_v5 }
 0x33e   : > { %v1116_v30 = vpop.f32.mrf.mxu3 }
 0x33f   : > { %v1960_v31 = vmul.f32 -1.442695, %v925_v28 }
 0x341   : > { %2070 = vpow2.f32 %v1960_v31 }
 0x342   : > { %v1034_v32 = vpop.f32.mrf.mxu1 }
 0x343   : > { %v1135_v33 = vpack.c.bf16 %v1034_v32, %v1034_v32 }
 0x345   : > { %v1163_v34 = vsel %vm1145_vm12, %v1135_v33, 0 }
 0x346   : > { %1172 = vmatpush.bf16.msra.mxu1 %v1163_v34 }
 0x347   : > { %v2071_v35 = vpop.eup %2070 }
 0x348   : > { %v929_v36 = vadd.f32 1.0, %v2071_v35 }
 0x349   : > { %1970 = vmatmul.msk.bf16.vlgmr.msra.gmra.mxu1 %vm1002_vm9, %v951_v5 }
 0x34a   : > { %2072 = vrcp.f32 %v929_v36  ;;  %v1036_v37 = vpop.f32.mrf.mxu1  ;;  %v941_v43 = vand.u32 2147483648, %v929_v36  ;;  %v939_v46 = vand.u32 2147483647, %v929_v36  ;;  %vm935_vm14 = vweird.f32 %v929_v36 }
 0x34c   : > { %v942_v48 = vor.u32 1.1754944e-38, %v941_v43  ;;  %vm940_vm2 = vcmp.eq.f32.partialorder %v939_v46, 8.507059e+37 }
 0x350   : > { %v2073_v38 = vpop.eup %2072 }
 0x351   : > { %v931_v39 = vmul.f32 %v2073_v38, %v929_v36  ;;  %vm936_vm13 = vweird.f32 %v2073_v38 }
 0x352   : > { %v1098_v40 = vpop.f32.mrf.mxu1  ;;  %vm937_vm15 = vmor %vm935_vm14, %vm936_vm13 }
 0x353   : > { %v1139_v41 = vpack.c.bf16 %v1098_v40, %v1098_v40  ;;  %v932_v42 = vsub.f32 1.0, %v931_v39 }
 0x355   : > { %v1227_v44 = vsel %vm1145_vm12, %v1139_v41, 0  ;;  %v933_v45 = vmul.f32 %v2073_v38, %v932_v42 }
 0x356   : > { %1236 = vmatpush.bf16.msrb.mxu1 %v1227_v44 }
 0x357   : > { %v934_v47 = vadd.f32 %v2073_v38, %v933_v45 }
 0x359   : > { %1974 = vmatmul.msk.bf16.vlgmr.msrb.gmra.mxu1 %vm1002_vm9, %v951_v5  ;;  %v938_v49 = vsel %vm937_vm15, %v2073_v38, %v934_v47 }
 0x35a   : > { %v1100_v50 = vpop.f32.mrf.mxu1  ;;  %v943_v51 = vsel %vm940_vm2, %v942_v48, %v938_v49 }
 0x35b   : > { %947 = vperm.xlu0 %2059, %v943_v51   ;;  %v1349_v50 = vld [vmem:[%s2619_s20] sm:$0xf] }
 0x35c   : > { %v1426_v51 = vsel %vm728_vm1, %v1349_v50, 0 }
 0x35d   : > { %1435 = vmatpush.bf16.xpose.msrb.mxu2 %v1426_v51  ;;  %1451 = vmatpush.bf16.xpose.msra.mxu1 %v1426_v51 }
 0x35e   : > { %1467 = vmatpush.bf16.xpose.msrb.mxu3 %v1426_v51  ;;  %1483 = vmatpush.bf16.xpose.msrb.mxu0 %v1426_v51 }
 0x365   : > { %1499 = vmatpush.bf16.xpose.msra.mxu2 %v1426_v51  ;;  %1515 = vmatpush.bf16.xpose.msrb.mxu1 %v1426_v51 }
 0x366   : > { %1531 = vmatpush.bf16.xpose.msra.mxu3 %v1426_v51  ;;  %1547 = vmatpush.bf16.xpose.msra.mxu0 %v1426_v51 }
 0x3a6   : > { %v1206_v52 = vpop.f32.mrf.mxu0 }
 0x3a7   : > { %v1281_v0 = vrot.slane %v1206_v52, 4 }
 0x3ad   : > { %v1158_v53 = vpop.f32.mrf.mxu2 }
 0x3ae   : > { %v1208_v54 = vpop.f32.mrf.mxu0 }
 0x3b0   : > { %v1190_v55 = vpop.f32.mrf.mxu3 }
 0x3b1   : > { %v1274_v3 = vrot.slane %v1190_v55, 4 }
 0x3b3   : > { %v1276_v7 = vsel %vm969_vm10, %v1274_v3, %v1158_v53 }
 0x3b4   : > { %v1280_v11 = vperm.slane %v1276_v7, %v2396_v26 }
 0x3b5   : > { %v1160_v56 = vpop.f32.mrf.mxu2 }
 0x3b6   : > { %v1270_v57 = vpop.f32.mrf.mxu0  ;;  %v1301_v27 = vrot.slane %v1280_v11, 4 }
 0x3b7   : > { %v1293_v10 = vrot.slane %v1270_v57, 4 }
 0x3b8   : > { %v1192_v58 = vpop.f32.mrf.mxu3 }
 0x3bd   : > { %v1222_v59 = vpop.f32.mrf.mxu2 }
 0x3be   : > { %v1272_v60 = vpop.f32.mrf.mxu0 }
 0x3c0   : > { %v1254_v61 = vpop.f32.mrf.mxu3 }
 0x3c1   : > { %v1287_v4 = vrot.slane %v1254_v61, 4 }
 0x3c3   : > { %v1288_v8 = vsel %vm969_vm10, %v1287_v4, %v1222_v59 }
 0x3c4   : > { %v1292_v12 = vperm.slane %v1288_v8, %v2396_v26 }
 0x3c5   : > { %v1224_v62 = vpop.f32.mrf.mxu2 }
 0x3c6   : > { %v1174_v63 = vpop.f32.mrf.mxu1  ;;  %v1313_v16 = vrot.slane %v1292_v12, 4 }
 0x3c7   : > { %v1282_v2 = vsel %vm969_vm10, %v1281_v0, %v1174_v63 }
 0x3c8   : > { %v1256_v1 = vpop.f32.mrf.mxu3  ;;  %v1286_v5 = vperm.slane %v1282_v2, %v2396_v26 }
 0x3ca   : > { %v1299_v9 = vrot.slane %v1286_v5, 4  ;;  %v1302_v34 = vsel %vm969_vm10, %v1286_v5, %v1301_v27 }
 0x3cb   : > { %v1310_v36 = vperm.slane %v1302_v34, %v2398_v29 }
 0x3cc   : > { %v1300_v14 = vsel %vm969_vm10, %v1299_v9, %v1280_v11 }
 0x3cd   : > { %v1306_v20 = vperm.slane %v1300_v14, %v2398_v29  ;;  %v1329_v38 = vrot.slane %v1310_v36, 4  ;;  %v948_v42 = vpop.permute.xlu0 %947 }
 0x3ce   : > { %v1176_v6 = vpop.f32.mrf.mxu1  ;;  %v950_v44 = vmul.f32 %v948_v42, %v889_v22 }
 0x3cf   : > { %v1325_v19 = vrot.slane %v1306_v20, 4 }
 0x3d6   : > { %v1238_v13 = vpop.f32.mrf.mxu1 }
 0x3d7   : > { %v1294_v15 = vsel %vm969_vm10, %v1293_v10, %v1238_v13 }
 0x3d8   : > { %v1298_v17 = vperm.slane %v1294_v15, %v2396_v26 }
 0x3da   : > { %v1311_v23 = vrot.slane %v1298_v17, 4  ;;  %v1314_v24 = vsel %vm969_vm10, %v1298_v17, %v1313_v16 }
 0x3db   : > { %v1322_v32 = vperm.slane %v1314_v24, %v2398_v29 }
 0x3dc   : > { %v1312_v25 = vsel %vm969_vm10, %v1311_v23, %v1292_v12 }
 0x3dd   : > { %v1318_v18 = vperm.slane %v1312_v25, %v2398_v29  ;;  %v1327_v35 = vrot.slane %v1322_v32, 4  ;;  %v1330_v39 = vsel %vm969_vm10, %v1322_v32, %v1329_v38 }
 0x3de   : > { %v1240_v28 = vpop.f32.mrf.mxu1 }
 0x3df   : > { %v1326_v30 = vsel %vm969_vm10, %v1318_v18, %v1325_v19  ;;  %v1323_v31 = vrot.slane %v1318_v18, 4  ;;  %v1328_v37 = vsel %vm969_vm10, %v1327_v35, %v1310_v36 }
 0x3e0   : > { %1332 = vrot.lane.b32.xlu2 %v1326_v30, %s2144_s26  ;;  %s2153_s26 = smov 40  }
 0x3e1   : > { %v1324_v33 = vsel %vm969_vm10, %v1323_v31, %v1306_v20 }
 0x3e8   : > { %1336 = vrot.lane.b32.xlu2 %v1328_v37, %s2145_s29 }
 0x3f0   : > { %1340 = vrot.lane.b32.xlu2 %v1330_v39, %s2146_s30  ;;  %s2155_s30 = smov 56  }
 0x43a   : > { %v1333_v40 = vpop.permute.xlu2 %1332 }
 0x43b   : > { %v1343_v43 = vsel %vm728_vm1, %v1324_v33, %v1333_v40  ;;  %v1348_v33 = vld [vmem:[%s2618_s19] sm:$0xf] }
 0x442   : > { %v1337_v41 = vpop.permute.xlu2 %1336 }
 0x443   : > { %v1344_v45 = vsel %vm740_vm3, %v1343_v43, %v1337_v41 }
 0x44a   : > { %v1341_v46 = vpop.permute.xlu2 %1340 }
 0x44b   : > { %v1346_v47 = vsel %vm1345_vm5, %v1344_v45, %v1341_v46 }
 0x44c   : > { %v1347_v48 = vadd.f32 %v1346_v47, %v950_v44 }
 0x44e   : > { %v1350_v49 = vpack.c.bf16 %v1347_v48, %v1347_v48 }
 0x450   : > { %1356 = vrot.lane.b32.xlu2 %v1350_v49, %s2147_s22  ;;  %1354 = vrot.lane.b32.xlu0 %v1350_v49, %s2148_s8  ;;  %v1361_v60 = vshrl.u32 %v1350_v49, 16  ;;  %s662_s22 = sand.u32 1, %s2128_s25  }
 0x451   : > { %s1937_s8 = sshll.u32 %s662_s22, 3 }
 0x452   : > { %s664_s0 = scalar_lea.vmem [#allocation2], %s1937_s8  ;;  %s2094_s8 = scalar_lea.hbm %s2620_s21, 16 }
 0x458   : > { %1352 = vrot.lane.b32.xlu0 %v1350_v49, %s2149_s24  ;;  %s1994_s24 = sshll.u32 %s2287_s3, 3  ;;  %s1847_s3 = scalar_lea.sflag [#allocation3], %s662_s22 }
 0x459   : > { %s1857_s10 = scalar_lea.hbm %s2620_s21, %s1994_s24 }
 0x4aa   : > { %v1357_v21 = vpop.permute.xlu2 %1356 }
 0x4ab   : > { %v1368_v53 = vshrl.u32 %v1357_v21, 16 }
 0x4c2   : > { %v1355_v22 = vpop.permute.xlu0 %1354 }
 0x4c3   : > { %v1367_v52 = vshrl.u32 %v1355_v22, 16  ;;  %v1366_v54 = vpack.i.b16 %v1357_v21, %v1355_v22 }
 0x4c5   : > { %v1369_v55 = vpack.i.b16 %v1368_v53, %v1367_v52  ;;  %v1379_v56 = vperm.slane %v1366_v54, %v2396_v26 }
 0x4c7   : > { %v1405_v58 = vperm.slane %v1369_v55, %v2396_v26  ;;  %v1380_v62 = vrot.slane %v1379_v56, 4 }
 0x4c9   : > { %v1406_v1 = vrot.slane %v1405_v58, 4 }
 0x4ca   : > { %v1353_v57 = vpop.permute.xlu0 %1352 }
 0x4cb   : > { %v1360_v59 = vpack.i.b16 %v1353_v57, %v1350_v49  ;;  %v1362_v61 = vshrl.u32 %v1353_v57, 16 }
 0x4cd   : > { %v1363_v63 = vpack.i.b16 %v1362_v61, %v1361_v60  ;;  %v1374_v0 = vperm.slane %v1360_v59, %v2396_v26 }
 0x4cf   : > { %v1381_v2 = vsel %vm969_vm10, %v1380_v62, %v1374_v0  ;;  %v1400_v3 = vperm.slane %v1363_v63, %v2396_v26  ;;  %v1382_v10 = vrot.slane %v1374_v0, 4 }
 0x4d0   : > { %v1387_v4 = vperm.slane %v1381_v2, %v2398_v29 }
 0x4d1   : > { %v1407_v5 = vsel %vm969_vm10, %v1406_v1, %v1400_v3  ;;  %v1408_v12 = vrot.slane %v1400_v3, 4  ;;  %v1383_v13 = vsel %vm969_vm10, %v1379_v56, %v1382_v10 }
 0x4d2   : > { %v1413_v6 = vperm.slane %v1407_v5, %v2398_v29  ;;  %1977 = vmatmul.msk.bf16.vlgmr.msrb.gmra.mxu2 %vm728_vm1, %v1387_v4  ;;  %v1392_v7 = vrot.slane %v1387_v4, 4  ;;  %v1391_v15 = vperm.slane %v1383_v13, %v2398_v29 }
 0x4d3   : > { %v1409_v14 = vsel %vm969_vm10, %v1405_v58, %v1408_v12 }
 0x4d4   : > { %1978 = vmatmul.msk.bf16.vlgmr.msra.gmra.mxu1 %vm728_vm1, %v1413_v6  ;;  %v1393_v8 = vsel %vm969_vm10, 0, %v1392_v7  ;;  %v1418_v9 = vrot.slane %v1413_v6, 4  ;;  %v1417_v16 = vperm.slane %v1409_v14, %v2398_v29  ;;  %v1394_v17 = vrot.slane %v1391_v15, 4 }
 0x4d5   : > { %1979 = vmatmul.msk.bf16.vlgmr.msrb.gmra.mxu3 %vm728_vm1, %v1393_v8 }
 0x4d6   : > { %v1419_v11 = vsel %vm969_vm10, 0, %v1418_v9  ;;  %v1420_v20 = vrot.slane %v1417_v16, 4  ;;  %v1395_v23 = vsel %vm969_vm10, 0, %v1394_v17 }
 0x4d7   : > { %1980 = vmatmul.msk.bf16.vlgmr.msrb.gmra.mxu0 %vm728_vm1, %v1419_v11 }
 0x4d8   : > { %v1421_v24 = vsel %vm969_vm10, 0, %v1420_v20 }
 0x4e2   : > { %1981 = vmatmul.msk.bf16.vlgmr.msra.gmra.mxu2 %vm728_vm1, %v1391_v15 }
 0x4e4   : > { %1982 = vmatmul.msk.bf16.vlgmr.msrb.gmra.mxu1 %vm728_vm1, %v1417_v16 }
 0x4e5   : > { %1983 = vmatmul.msk.bf16.vlgmr.msra.gmra.mxu3 %vm728_vm1, %v1395_v23 }
 0x4e7   : > { %1984 = vmatmul.msk.bf16.vlgmr.msra.gmra.mxu0 %vm728_vm1, %v1421_v24 }
 0x551   : > { %v1453_v25 = vpop.f32.mrf.mxu1 }
 0x552   : > { %v1554_v18 = vpack.c.bf16 %v1453_v25, %v1453_v25 }
 0x554   : > { %v1582_v19 = vsel %vm1564_vm6, %v1554_v18, 0  ;;  %v1485_v27 = vpop.f32.mrf.mxu0 }
 0x555   : > { %v1556_v28 = vpack.c.bf16 %v1485_v27, %v1485_v27  ;;  %v1437_v30 = vpop.f32.mrf.mxu2  ;;  %1591 = vmatpush.bf16.msra.mxu1 %v1582_v19 }
 0x556   : > { %v1553_v31 = vpack.c.bf16 %v1437_v30, %v1437_v30 }
 0x557   : > { %v1614_v32 = vsel %vm1564_vm6, %v1556_v28, 0 }
 0x558   : > { %v1566_v34 = vsel %vm1564_vm6, %v1553_v31, 0  ;;  %v1469_v35 = vpop.f32.mrf.mxu3  ;;  %1623 = vmatpush.bf16.msrb.mxu0 %v1614_v32  ;;  %1986 = vmatmul.msk.bf16.vlgmr.msra.gmra.mxu1 %vm728_vm1, %v1348_v33 }
 0x559   : > { %v1555_v36 = vpack.c.bf16 %v1469_v35, %v1469_v35  ;;  %v1455_v37 = vpop.f32.mrf.mxu1  ;;  %1575 = vmatpush.bf16.msrb.mxu2 %v1566_v34 }
 0x55b   : > { %v1598_v38 = vsel %vm1564_vm6, %v1555_v36, 0  ;;  %1988 = vmatmul.msk.bf16.vlgmr.msrb.gmra.mxu0 %vm728_vm1, %v1348_v33 }
 0x55c   : > { %v1487_v39 = vpop.f32.mrf.mxu0  ;;  %1607 = vmatpush.bf16.msrb.mxu3 %v1598_v38  ;;  %1985 = vmatmul.msk.bf16.vlgmr.msrb.gmra.mxu2 %vm728_vm1, %v1348_v33 }
 0x55d   : > { %v1439_v40 = vpop.f32.mrf.mxu2 }
 0x55f   : > { %1987 = vmatmul.msk.bf16.vlgmr.msrb.gmra.mxu3 %vm728_vm1, %v1348_v33 }
 0x560   : > { %v1471_v41 = vpop.f32.mrf.mxu3 }
 0x561   : > { %v1517_v42 = vpop.f32.mrf.mxu1 }
 0x562   : > { %v1558_v43 = vpack.c.bf16 %v1517_v42, %v1517_v42 }
 0x564   : > { %v1646_v44 = vsel %vm1564_vm6, %v1558_v43, 0  ;;  %v1549_v45 = vpop.f32.mrf.mxu0 }
 0x565   : > { %v1560_v46 = vpack.c.bf16 %v1549_v45, %v1549_v45  ;;  %v1501_v47 = vpop.f32.mrf.mxu2  ;;  %1655 = vmatpush.bf16.msrb.mxu1 %v1646_v44 }
 0x566   : > { %v1557_v48 = vpack.c.bf16 %v1501_v47, %v1501_v47 }
 0x567   : > { %v1678_v49 = vsel %vm1564_vm6, %v1560_v46, 0 }
 0x568   : > { %v1630_v50 = vsel %vm1564_vm6, %v1557_v48, 0  ;;  %v1533_v51 = vpop.f32.mrf.mxu3  ;;  %1687 = vmatpush.bf16.msra.mxu0 %v1678_v49  ;;  %1990 = vmatmul.msk.bf16.vlgmr.msrb.gmra.mxu1 %vm728_vm1, %v1348_v33 }
 0x569   : > { %v1559_v21 = vpack.c.bf16 %v1533_v51, %v1533_v51  ;;  %v1519_v22 = vpop.f32.mrf.mxu1  ;;  %1639 = vmatpush.bf16.msra.mxu2 %v1630_v50 }
 0x56b   : > { %v1662_v52 = vsel %vm1564_vm6, %v1559_v21, 0  ;;  %1992 = vmatmul.msk.bf16.vlgmr.msra.gmra.mxu0 %vm728_vm1, %v1348_v33 }
 0x56c   : > { %v1551_v53 = vpop.f32.mrf.mxu0  ;;  %1671 = vmatpush.bf16.msra.mxu3 %v1662_v52  ;;  %1989 = vmatmul.msk.bf16.vlgmr.msra.gmra.mxu2 %vm728_vm1, %v1348_v33 }
 0x56d   : > { %v1503_v54 = vpop.f32.mrf.mxu2 }
 0x56f   : > { %1991 = vmatmul.msk.bf16.vlgmr.msra.gmra.mxu3 %vm728_vm1, %v1348_v33  ;;  %vm1835_vm1 = vcmask 195584  }
 0x570   : > { %v1535_v55 = vpop.f32.mrf.mxu3 }
 0x5d5   : > { %v1593_v56 = vpop.f32.mrf.mxu1 }
 0x5d6   : > { %v1707_v10 = vrot.slane %v1593_v56, 4 }
 0x5d8   : > { %v1625_v57 = vpop.f32.mrf.mxu0 }
 0x5d9   : > { %v1705_v62 = vrot.slane %v1625_v57, 4  ;;  %v1708_v17 = vsel %vm969_vm10, %v1625_v57, %v1707_v10 }
 0x5da   : > { %v1716_v28 = vperm.slane %v1708_v17, %v2396_v26 }
 0x5db   : > { %v1706_v1 = vsel %vm969_vm10, %v1705_v62, %v1593_v56 }
 0x5dc   : > { %v1712_v7 = vperm.slane %v1706_v1, %v2396_v26  ;;  %v1753_v41 = vrot.slane %v1716_v28, 4 }
 0x5dd   : > { %v1595_v58 = vpop.f32.mrf.mxu1 }
 0x5de   : > { %v1741_v14 = vrot.slane %v1712_v7, 4 }
 0x5df   : > { %v1577_v59 = vpop.f32.mrf.mxu2 }
 0x5e0   : > { %v1627_v60 = vpop.f32.mrf.mxu0  ;;  %v1695_v18 = vrot.slane %v1577_v59, 4 }
 0x5e2   : > { %v1609_v61 = vpop.f32.mrf.mxu3 }
 0x5e3   : > { %v1693_v63 = vrot.slane %v1609_v61, 4  ;;  %v1696_v36 = vsel %vm969_vm10, %v1609_v61, %v1695_v18 }
 0x5e4   : > { %v1704_v43 = vperm.slane %v1696_v36, %v2396_v26 }
 0x5e5   : > { %v1657_v0 = vpop.f32.mrf.mxu1  ;;  %v1694_v3 = vsel %vm969_vm10, %v1693_v63, %v1577_v59 }
 0x5e6   : > { %v1731_v5 = vrot.slane %v1657_v0, 4  ;;  %v1700_v9 = vperm.slane %v1694_v3, %v2396_v26  ;;  %v1754_v54 = vsel %vm969_vm10, %v1753_v41, %v1704_v43  ;;  %v1755_v61 = vrot.slane %v1704_v43, 4 }
 0x5e7   : > { %v1579_v2 = vpop.f32.mrf.mxu2  ;;  %v1760_v59 = vperm.slane %v1754_v54, %v2398_v29 }
 0x5e8   : > { %v1689_v4 = vpop.f32.mrf.mxu0  ;;  %v1743_v15 = vrot.slane %v1700_v9, 4  ;;  %v1742_v27 = vsel %vm969_vm10, %v1741_v14, %v1700_v9  ;;  %v1756_v2 = vsel %vm969_vm10, %v1716_v28, %v1755_v61 }
 0x5e9   : > { %v1729_v6 = vrot.slane %v1689_v4, 4  ;;  %v1732_v12 = vsel %vm969_vm10, %v1689_v4, %v1731_v5  ;;  %v1748_v38 = vperm.slane %v1742_v27, %v2398_v29  ;;  %v1764_v4 = vperm.slane %v1756_v2, %v2398_v29 }
 0x5ea   : > { %v1611_v8 = vpop.f32.mrf.mxu3  ;;  %v1740_v24 = vperm.slane %v1732_v12, %v2396_v26  ;;  %v1744_v32 = vsel %vm969_vm10, %v1712_v7, %v1743_v15 }
 0x5eb   : > { %v1730_v11 = vsel %vm969_vm10, %v1729_v6, %v1657_v0  ;;  %v1752_v40 = vperm.slane %v1744_v32, %v2398_v29  ;;  %v1791_v48 = vrot.slane %v1748_v38, 4  ;;  %v1799_v0 = vrot.slane %v1760_v59, 4 }
 0x5ec   : > { %v1736_v23 = vperm.slane %v1730_v11, %v2396_v26  ;;  %v1777_v34 = vrot.slane %v1740_v24, 4  ;;  %v1803_v7 = vrot.slane %v1764_v4, 4 }
 0x5ed   : > { %v1659_v13 = vpop.f32.mrf.mxu1  ;;  %v1795_v50 = vrot.slane %v1752_v40, 4 }
 0x5ee   : > { %v1765_v33 = vrot.slane %v1736_v23, 4 }
 0x5ef   : > { %v1641_v16 = vpop.f32.mrf.mxu2 }
 0x5f0   : > { %v1719_v20 = vrot.slane %v1641_v16, 4  ;;  %v1691_v25 = vpop.f32.mrf.mxu0 }
 0x5f2   : > { %v1673_v19 = vpop.f32.mrf.mxu3 }
 0x5f3   : > { %v1717_v30 = vrot.slane %v1673_v19, 4  ;;  %v1720_v31 = vsel %vm969_vm10, %v1673_v19, %v1719_v20 }
 0x5f4   : > { %v1728_v35 = vperm.slane %v1720_v31, %v2396_v26 }
 0x5f5   : > { %v1718_v37 = vsel %vm969_vm10, %v1717_v30, %v1641_v16 }
 0x5f6   : > { %v1724_v39 = vperm.slane %v1718_v37, %v2396_v26  ;;  %v1778_v45 = vsel %vm969_vm10, %v1777_v34, %v1728_v35  ;;  %v1779_v26 = vrot.slane %v1728_v35, 4 }
 0x5f7   : > { %v1643_v42 = vpop.f32.mrf.mxu2  ;;  %v1784_v53 = vperm.slane %v1778_v45, %v2398_v29 }
 0x5f8   : > { %v1767_v44 = vrot.slane %v1724_v39, 4  ;;  %v1766_v46 = vsel %vm969_vm10, %v1765_v33, %v1724_v39  ;;  %v1780_v62 = vsel %vm969_vm10, %v1740_v24, %v1779_v26 }
 0x5f9   : > { %v1772_v47 = vperm.slane %v1766_v46, %v2398_v29  ;;  %v1797_v60 = vrot.slane %v1784_v53, 4  ;;  %v1788_v1 = vperm.slane %v1780_v62, %v2398_v29  ;;  %v1800_v3 = vsel %vm969_vm10, %v1784_v53, %v1799_v0 }
 0x5fa   : > { %v1768_v49 = vsel %vm969_vm10, %v1736_v23, %v1767_v44  ;;  %v1675_v51 = vpop.f32.mrf.mxu3 }
 0x5fb   : > { %v1792_v21 = vsel %vm969_vm10, %v1772_v47, %v1791_v48  ;;  %v1789_v22 = vrot.slane %v1772_v47, 4  ;;  %v1776_v52 = vperm.slane %v1768_v49, %v2398_v29  ;;  %v1798_v63 = vsel %vm969_vm10, %v1797_v60, %v1760_v59 }
 0x5fc   : > { %1806 = vrot.lane.b32.xlu2 %v1792_v21, %s2145_s29  ;;  %v1801_v5 = vrot.slane %v1788_v1, 4  ;;  %s2154_s29 = smov 48   ;;  %v1804_v8 = vsel %vm969_vm10, %v1788_v1, %v1803_v7 }
 0x5fd   : > { %v1796_v55 = vsel %vm969_vm10, %v1776_v52, %v1795_v50  ;;  %v1793_v56 = vrot.slane %v1776_v52, 4  ;;  %v1790_v57 = vsel %vm969_vm10, %v1789_v22, %v1748_v38 }
 0x5fe   : > { %1814 = vrot.lane.b32.xlu0 %v1796_v55, %s2150_s4  ;;  %v1802_v6 = vsel %vm969_vm10, %v1801_v5, %v1764_v4  ;;  %s1859_s4 = sshll.u32 %s664_s0, 4  ;;  %s1860_s4 = int_to_ptr.vmem [resolvable:$true] %s1859_s4 }
 0x5ff   : > { %v1794_v58 = vsel %vm969_vm10, %v1793_v56, %v1752_v40 }
 0x600   : > { %1810 = vrot.lane.b32.xlu1 %v1794_v58, %s2151_s23  ;;  %s1861_s23 = sshll.u32 %s1857_s10, 4  ;;  %s1862_s23 = int_to_ptr.hbm [resolvable:$true] %s1861_s23 }
 0x604   : > { %1818 = vrot.lane.b32.xlu2 %v1798_v63, %s2152_s1  ;;  %s2088_s1 = sshra.s32 %s1862_s23, 4  ;;  %s2089_s1 = int_to_ptr.hbm [resolvable:$true] %s2088_s1 }
 0x605   : > { %p2095_p0 = scmp.lt.s32.totalorder %s2089_s1, %s2620_s21 }
 0x606   : > { %1822 = vrot.lane.b32.xlu0 %v1800_v3, %s2153_s26  ;;  %s2090_s26 = scalar_lea.hbm %s2089_s1, 8 }
 0x607   : > { %p2091_p11 = scmp.ne.s32.totalorder %s2089_s1, %s2090_s26  ;;  %p2096_p1 = scmp.lt.s32.totalorder %s2094_s8, %s2090_s26 }
 0x609   : > { %p2092_p12 = pnand %p2091_p11, %p2304_p5  ;;  %p2097_p2 = por %p2096_p1, %p2095_p0 }
 0x60b   : > { %p2093_p13 = pneg %p2092_p12 }
 0x60c   : > { %1826 = vrot.lane.b32.xlu2 %v1802_v6, %s2154_s29 }
 0x60d   : > { %p2098_p3 = pnand %p2097_p2, %p2093_p13 }
 0x60e   : > { %1830 = vrot.lane.b32.xlu0 %v1804_v8, %s2155_s30 }
 0x656   : > { %v1807_v9 = vpop.permute.xlu2 %1806 }
 0x657   : > { %v1833_v12 = vsel %vm740_vm3, %v1790_v57, %v1807_v9  ;;  %vm1842_vm3 = vcmask 457728  }
 0x65e   : > { %v1819_v13 = vpop.permute.xlu2 %1818 }
 0x666   : > { %v1827_v20 = vpop.permute.xlu2 %1826 }
 0x670   : > { %v1815_v10 = vpop.permute.xlu0 %1814 }
 0x672   : > { %v1811_v11 = vpop.permute.xlu1 %1810 }
 0x673   : > { %v1834_v29 = vsel %vm860_vm4, %v1833_v12, %v1811_v11  ;;  %vm1844_vm4 = vcmask 523264  }
 0x674   : > { %v1836_v15 = vsel %vm1835_vm1, %v1834_v29, %v1815_v10 }
 0x675   : > { %v1837_v16 = vsel %vm698_vm0, %v1836_v15, %v1819_v13 }
 0x678   : > { %v1823_v14 = vpop.permute.xlu0 %1822 }
 0x679   : > { %v1839_v17 = vsel %vm1838_vm7, %v1837_v16, %v1823_v14 }
 0x67a   : > { %v1841_v24 = vsel %vm1840_vm8, %v1839_v17, %v1827_v20 }
 0x680   : > { %v1831_v23 = vpop.permute.xlu0 %1830 }
 0x681   : > { %v1843_v25 = vsel %vm1842_vm3, %v1841_v24, %v1831_v23 }
 0x682   : > { %1845 = vst.msk [vmem:[%s664_s0] sm:$0xff] %vm1844_vm4, %v1843_v25 }
 0x683   : > { %2101 = shalt.err (!%p2098_p3)
}
 0x684   : > { %2002 = dma.vmem_to_hbm [thread:$0]  (%p2304_p5), %s1860_s4, 128, %s1862_s23, %s1847_s3  }
 0x685 PF: > { %p2008_p4 = scmp.ge.s32.totalorder %s2136_s27, 2  ;;  %s1873_s9 = sand.u32 1, %s2124_s2  }
 0x686   : > { %s1874_s10 = scalar_lea.sflag [#allocation3], %s1873_s9 }
 0x687   : > { %p2005_p7 = pnand %p2008_p4, %p2308_p6 }
 0x689   : > { %p2006_p8 = pneg %p2005_p7 }
 0x68b   : > { %2119 = dma.done.wait (%p2006_p8), %s1874_s10, 128  }
 0x68c   : > { %2121 = vsyncadd (%p2006_p8), %s1874_s10, 4294967168  ;;  %s2650_s27 = sld [smem:[#allocation6_spill]]  ;;  %s2653_s2 = smov %s2128_s25 }
 0x68d   : > { %s2651_s0 = sld [smem:[#allocation5_spill]] }
 0x68e   : > { %s2652_s26 = sld [smem:[#allocation7_spill]] }
 0x692   : > { %p31_p9 = scmp.ge.s32.totalorder %s2650_s27, 4  }
 0x693   : > { %s2654_s25 = smov %s2651_s0 }
 0x694   :  { %33 = sbr.rel (!%p31_p9) target bundleno = 13 (0xd), region = 142 }
 0x699   :  { %1880 = vsyncpa [#allocation3], 1 }
 0x69a   :  { %1882 = vsyncpa [#allocation3 + $0x1], 1 }

</bundles_post_ra>
